<compile_context>
chip_gen: v7x
topology: tpu7x:2x2x1
jax: 0.10.0
libtpu: 0.0.40
codegen_flags: <defaults>
</compile_context>

<pallas_src>
import functools
import math

import jax
import jax.numpy as jnp
from jax.experimental import pallas as pl
from jax.experimental.pallas import tpu as pltpu

LANE = 128
_VMEM_LIMIT = 48 * 1024 * 1024       # below v7x physical 64 MiB
_TILE_BUDGET = 28 * 1024 * 1024      # working-set budget for tiled kernels
_RESIDENT_BUDGET = 20 * 1024 * 1024  # eligibility for the whole-stack-in-VMEM path


def _round_up(v, m):
    return ((v + m - 1) // m) * m


def _dtype_bytes(dt):
    return jnp.dtype(dt).itemsize


def _pick_tiles(m, k, lanes, out_bytes, budget=_TILE_BUDGET):
    """Largest (tm, tk) MXU tiles whose double-buffered working set fits."""
    best, best_score = (128, min(k, 128)), -1
    for tm in (512, 256, 128):
        if m % tm:
            continue
        for tk in (2048, 1024, 512, 256, 128):
            if k % tk:
                continue
            use = (2 * tm * tk * 2               # LHS blocks (bf16, 2 buffers)
                   + 2 * tk * lanes * 2          # RHS blocks (bf16, 2 buffers)
                   + tm * lanes * 4              # f32 accumulator
                   + 2 * tm * lanes * out_bytes  # output blocks
                   + 4 * lanes * 4)              # bias / alpha
            score = tm * tk
            if use <= budget and score > best_score:
                best, best_score = (tm, tk), score
    return best


# ----------------------------------------------------------------------------
# Shared tiled-GEMM kernel body:
#   out_tile = act( sum_k L_tile @ R_block  [+ bias] )
# The contraction is the last grid axis.  When the output dtype is f32 the
# accumulation happens directly in o_ref (no scratch); otherwise an f32 VMEM
# scratch accumulates and the epilogue casts on the final k step.
# ----------------------------------------------------------------------------
def _gemm_bias_act_kernel(*refs, act, k_axis, has_bias, use_scratch):
    it = iter(refs)
    l_ref = next(it)
    r_ref = next(it)
    bias_ref = next(it) if has_bias else None
    alpha_ref = next(it) if act == "prelu" else None
    o_ref = next(it)
    acc_ref = next(it) if use_scratch else o_ref

    k = pl.program_id(k_axis)

    @pl.when(k == 0)
    def _init():
        acc_ref[...] = jnp.zeros_like(acc_ref)

    acc_ref[...] += jnp.dot(l_ref[...], r_ref[...],
                            preferred_element_type=jnp.float32)

    needs_epilogue = has_bias or act != "none" or use_scratch
    if needs_epilogue:
        @pl.when(k == pl.num_programs(k_axis) - 1)
        def _finalize():
            h = acc_ref[...]
            if has_bias:
                h = h + bias_ref[...]
            if act == "prelu":
                h = jnp.where(h >= 0.0, h, alpha_ref[...] * h)
            elif act == "relu":
                h = jnp.maximum(h, 0.0)
            o_ref[...] = h.astype(o_ref.dtype)


# ----------------------------------------------------------------------------
# Tiled streaming kernels (all dims already padded to lane multiples)
# ----------------------------------------------------------------------------
def aggregate(a, x, *, bias=None, alpha=None, act="none", out_dtype=jnp.float32):
    """out = act(a @ x [+ bias]).  a:(N,N) bf16, x:(N,Hc) bf16 where Hc already
    carries the batch folded into lanes, so Â is streamed from HBM once."""
    N, N2 = a.shape
    Nx, Hc = x.shape
    assert N == N2 == Nx
    tm, tk = _pick_tiles(N, N, Hc, _dtype_bytes(out_dtype))
    grid = (N // tm, N // tk)
    use_scratch = out_dtype != jnp.float32
    has_bias = bias is not None

    in_specs = [pl.BlockSpec((tm, tk), lambda i, k: (i, k)),
                pl.BlockSpec((tk, Hc), lambda i, k: (k, 0))]
    ops = [a, x]
    if has_bias:
        in_specs.append(pl.BlockSpec((1, Hc), lambda i, k: (0, 0)))
        ops.append(bias)
    if act == "prelu":
        in_specs.append(pl.BlockSpec((1, Hc), lambda i, k: (0, 0)))
        ops.append(alpha)

    kernel = functools.partial(_gemm_bias_act_kernel, act=act, k_axis=1,
                               has_bias=has_bias, use_scratch=use_scratch)
    return pl.pallas_call(
        kernel,
        out_shape=jax.ShapeDtypeStruct((N, Hc), out_dtype),
        grid_spec=pltpu.PrefetchScalarGridSpec(
            num_scalar_prefetch=0,
            grid=grid,
            in_specs=in_specs,
            out_specs=pl.BlockSpec((tm, Hc), lambda i, k: (i, 0)),
            scratch_shapes=([pltpu.VMEM((tm, Hc), jnp.float32)]
                            if use_scratch else []),
        ),
        compiler_params=pltpu.CompilerParams(
            dimension_semantics=("parallel", "arbitrary"),
            vmem_limit_bytes=_VMEM_LIMIT,
        ),
    )(*ops)


def dense_transform(x_cat, w, *, n_batch, bias=None, alpha=None, act="none",
                    out_dtype=jnp.float32):
    """out[:, b*H:(b+1)*H] = act(x_cat[:, b*K:(b+1)*K] @ w [+ bias]).
    The batch stays folded in the lane dimension; only the small W is
    re-streamed per batch element."""
    M, KB = x_cat.shape
    K, H = w.shape
    assert KB == n_batch * K
    tm, tk = _pick_tiles(M, K, H, _dtype_bytes(out_dtype))
    kb = K // tk
    grid = (n_batch, M // tm, K // tk)
    use_scratch = out_dtype != jnp.float32
    has_bias = bias is not None

    in_specs = [pl.BlockSpec((tm, tk), lambda b, i, k: (i, b * kb + k)),
                pl.BlockSpec((tk, H), lambda b, i, k: (k, 0))]
    ops = [x_cat, w]
    if has_bias:
        in_specs.append(pl.BlockSpec((1, H), lambda b, i, k: (0, 0)))
        ops.append(bias)
    if act == "prelu":
        in_specs.append(pl.BlockSpec((1, H), lambda b, i, k: (0, 0)))
        ops.append(alpha)

    kernel = functools.partial(_gemm_bias_act_kernel, act=act, k_axis=2,
                               has_bias=has_bias, use_scratch=use_scratch)
    return pl.pallas_call(
        kernel,
        out_shape=jax.ShapeDtypeStruct((M, n_batch * H), out_dtype),
        grid_spec=pltpu.PrefetchScalarGridSpec(
            num_scalar_prefetch=0,
            grid=grid,
            in_specs=in_specs,
            out_specs=pl.BlockSpec((tm, H), lambda b, i, k: (i, b)),
            scratch_shapes=([pltpu.VMEM((tm, H), jnp.float32)]
                            if use_scratch else []),
        ),
        compiler_params=pltpu.CompilerParams(
            dimension_semantics=("parallel", "parallel", "arbitrary"),
            vmem_limit_bytes=_VMEM_LIMIT,
        ),
    )(*ops)


# ----------------------------------------------------------------------------
# Whole-stack VMEM-resident kernel (Â + every layer + both batch passes in one
# pallas_call).  Used whenever the graph fits the VMEM budget.
# ----------------------------------------------------------------------------
def _stack_kernel(*refs, meta, n_batch, f0_p, out_hp):
    a_ref, h_ref = refs[0], refs[1]
    o_ref = refs[-1]
    params = refs[2:-1]

    a = a_ref[...]                                      # Â resident in VMEM
    hs = [h_ref[:, b * f0_p:(b + 1) * f0_p] for b in range(n_batch)]
    pi = 0
    n_l = len(meta)
    for li, (fin_p, fout_p, act, has_bias) in enumerate(meta):
        w = params[pi][...]; pi += 1
        bias = None
        if has_bias:
            bias = params[pi][...]; pi += 1
        alpha = None
        if act == "prelu":
            alpha = params[pi][...]; pi += 1
        last = li == n_l - 1
        nxt = []
        for h in hs:
            if fin_p > fout_p:
                # X@W first (fewer FLOPs, narrower aggregation slab)
                t = jnp.dot(h, w, preferred_element_type=jnp.float32)
                z = jnp.dot(a, t.astype(jnp.bfloat16),
                            preferred_element_type=jnp.float32)
            else:
                t = jnp.dot(a, h, preferred_element_type=jnp.float32)
                z = jnp.dot(t.astype(jnp.bfloat16), w,
                            preferred_element_type=jnp.float32)
            if has_bias:
                z = z + bias
            if act == "prelu":
                z = jnp.where(z >= 0.0, z, alpha * z)
            elif act == "relu":
                z = jnp.maximum(z, 0.0)
            nxt.append(z if last else z.astype(jnp.bfloat16))
        hs = nxt
    for b in range(n_batch):
        o_ref[:, b * out_hp:(b + 1) * out_hp] = hs[b].astype(o_ref.dtype)


def fused_stack(a_pad, h0_cat, layer_params, *, n_batch, out_hp):
    ops = [a_pad, h0_cat]
    meta = []
    for lyr in layer_params:
        ops.append(lyr["w"])
        ops.append(lyr["b"])
        if lyr["act"] == "prelu":
            ops.append(lyr["alpha"])
        meta.append((lyr["fin_p"], lyr["fout_p"], lyr["act"], True))
    n_p = a_pad.shape[0]
    f0_p = layer_params[0]["fin_p"]
    kernel = functools.partial(_stack_kernel, meta=tuple(meta),
                               n_batch=n_batch, f0_p=f0_p, out_hp=out_hp)
    vmem = pl.BlockSpec(memory_space=pltpu.MemorySpace.VMEM)
    return pl.pallas_call(
        kernel,
        out_shape=jax.ShapeDtypeStruct((n_p, n_batch * out_hp), jnp.float32),
        in_specs=[vmem] * len(ops),
        out_specs=vmem,
        compiler_params=pltpu.CompilerParams(vmem_limit_bytes=_VMEM_LIMIT),
    )(*ops)


# ----------------------------------------------------------------------------
# Encoder (GCN stack) — parameter setup + dispatch; all compute in Pallas
# ----------------------------------------------------------------------------
class PallasEncoder:
    def __init__(self, in_feats, n_hidden, n_layers, key, dropout=0.0):
        # DGI's GCN builds (n_layers + 1) GraphConv layers:
        #   [in->hid, PReLU] + (n_layers-1)*[hid->hid, PReLU] + [hid->hid, none]
        # TODO(synk): training-mode dropout between layers not implemented
        # (eval-mode forward => dropout is identity).
        self.dropout = dropout
        self.in_feats = in_feats
        self.n_hidden = n_hidden
        dims = [in_feats] + [n_hidden] * (n_layers + 1)
        acts = ["prelu"] * n_layers + ["none"]

        self.layers = []
        self.logical_layers = []   # unpadded f32 params (for reference checks)
        for li in range(n_layers + 1):
            fin, fout = dims[li], dims[li + 1]
            fin_p, fout_p = _round_up(fin, LANE), _round_up(fout, LANE)
            key, kw = jax.random.split(key)
            limit = math.sqrt(6.0 / (fin + fout))            # xavier_uniform
            w = jax.random.uniform(kw, (fin, fout), jnp.float32, -limit, limit)
            b = jnp.zeros((1, fout), jnp.float32)            # DGL GraphConv bias init
            # NOTE: torch nn.PReLU() default is one shared scalar (0.25); stored
            # broadcast per-channel here — identical at init time.
            alpha = jnp.full((1, fout), 0.25, jnp.float32)
            self.logical_layers.append((w, b, alpha, acts[li]))

            w_p = jnp.zeros((fin_p, fout_p), jnp.float32).at[:fin, :fout].set(w)
            b_p = jnp.zeros((1, fout_p), jnp.float32).at[:, :fout].set(b)
            a_p = jnp.zeros((1, fout_p), jnp.float32).at[:, :fout].set(alpha)
            self.layers.append(dict(
                w=w_p.astype(jnp.bfloat16),   # bf16 MXU weights, cast once
                b=b_p, alpha=a_p, act=acts[li],
                fin_p=fin_p, fout_p=fout_p))

    # --- streaming (tiled) per-layer path, batch folded into lanes ----------
    def _layer_streaming(self, a_pad, h_cat, lyr, n_batch, out_dtype):
        act = lyr["act"]
        fin_p, fout_p = lyr["fin_p"], lyr["fout_p"]
        w, bias = lyr["w"], lyr["b"]
        alpha = lyr["alpha"] if act == "prelu" else None
        if fin_p > fout_p:
            # X@W first, then Â-aggregation fused with bias + activation.
            xw = dense_transform(h_cat, w, n_batch=n_batch,
                                 act="none", out_dtype=jnp.bfloat16)
            bias_c = jnp.tile(bias, (1, n_batch))
            alpha_c = jnp.tile(alpha, (1, n_batch)) if alpha is not None else None
            return aggregate(a_pad, xw, bias=bias_c, alpha=alpha_c, act=act,
                             out_dtype=out_dtype)
        else:
            # Â-aggregation first, then dense transform fused with bias + act.
            ah = aggregate(a_pad, h_cat, act="none", out_dtype=jnp.bfloat16)
            return dense_transform(ah, w, n_batch=n_batch, bias=bias,
                                   alpha=alpha, act=act, out_dtype=out_dtype)

    def _fits_resident(self, n_p, n_batch):
        max_fp = max(max(l["fin_p"], l["fout_p"]) for l in self.layers)
        param_bytes = sum(l["w"].size * 2 + l["b"].size * 4 + l["alpha"].size * 4
                          for l in self.layers)
        est = (n_p * n_p * 2                                  # Â (bf16)
               + n_batch * n_p * max_fp * 10                  # h + f32 temps (slack)
               + param_bytes
               + n_batch * n_p * self.layers[-1]["fout_p"] * 4)
        return est <= _RESIDENT_BUDGET

    def _run(self, a_hat, feats_list, force_streaming=False):
        """feats_list: list of (N, F) feature matrices (e.g. clean, corrupted).
        The batch is folded into the lane dimension so Â is streamed once."""
        n_batch = len(feats_list)
        N, F = feats_list[0].shape
        assert F == self.in_feats
        n_p = _round_up(N, LANE)
        f0_p = self.layers[0]["fin_p"]
        h_p = self.layers[-1]["fout_p"]

        a_pad = (jnp.zeros((n_p, n_p), jnp.float32)
                 .at[:N, :N].set(a_hat).astype(jnp.bfloat16))
        h_cat = jnp.zeros((n_p, n_batch * f0_p), jnp.float32)
        for b, f in enumerate(feats_list):
            h_cat = h_cat.at[:N, b * f0_p:b * f0_p + F].set(f)
        h_cat = h_cat.astype(jnp.bfloat16)

        if (not force_streaming) and self._fits_resident(n_p, n_batch):
            out = fused_stack(a_pad, h_cat, self.layers,
                              n_batch=n_batch, out_hp=h_p)
        else:
            # TODO(synk): for graphs too large for full VMEM residency the two
            # GEMMs of a layer still round-trip the XW intermediate via HBM.
            h = h_cat
            last = len(self.layers) - 1
            for li, lyr in enumerate(self.layers):
                out_dtype = jnp.float32 if li == last else jnp.bfloat16
                h = self._layer_streaming(a_pad, h, lyr, n_batch, out_dtype)
            out = h
        return [out[:N, b * h_p:b * h_p + self.n_hidden]
                for b in range(n_batch)]

    def __call__(self, a_hat, features, corrupt=False, key=None):
        if corrupt:
            perm = jax.random.permutation(key, features.shape[0])  # torch.randperm
            features = features[perm]
        return self._run(a_hat, [features])[0]

    def forward_pair(self, a_hat, features, key, force_streaming=False):
        """Clean + corrupted forward in ONE set of kernels (batch in lanes)."""
        perm = jax.random.permutation(key, features.shape[0])
        outs = self._run(a_hat, [features, features[perm]],
                         force_streaming=force_streaming)
        return outs[0], outs[1]


# ----------------------------------------------------------------------------
# Graph glue: dense symmetric normalization  Â = D^-1/2 (A + I) D^-1/2
# ----------------------------------------------------------------------------
def normalize_adj(adj):
    n = adj.shape[0]
    a = adj + jnp.eye(n, dtype=adj.dtype)
    deg = a.sum(axis=1)
    d_inv_sqrt = jnp.where(deg > 0, 1.0 / jnp.sqrt(deg), 0.0)
    return a * d_inv_sqrt[:, None] * d_inv_sqrt[None, :]


# plain-JAX f32 reference of the same forward (loose numerical check)
def reference_encoder(a_hat, features, logical_layers):
    h = features
    for (w, b, alpha, act) in logical_layers:
        h = a_hat @ (h @ w) + b
        if act == "prelu":
            h = jnp.where(h >= 0.0, h, alpha * h)
        elif act == "relu":
            h = jnp.maximum(h, 0.0)
    return h


# ----------------------------------------------------------------------------
if __name__ == "__main__":
    key = jax.random.PRNGKey(0)
    k_adj, k_feat, k_param, k_perm = jax.random.split(key, 4)

    N = 100          # nodes (not a multiple of 128 -> exercises padding)
    in_feats = 200   # > n_hidden -> first layer uses the X@W-first order
    n_hidden = 96
    n_layers = 1     # -> 2 GraphConv layers total

    # random undirected graph
    rand = jax.random.uniform(k_adj, (N, N))
    adj = (rand + rand.T > 1.5).astype(jnp.float32)
    adj = adj * (1.0 - jnp.eye(N))
    a_hat = normalize_adj(adj)

    features = jax.random.normal(k_feat, (N, in_feats), jnp.float32)

    enc = PallasEncoder(in_feats, n_hidden, n_layers, k_param, dropout=0.0)

    # whole-stack VMEM-resident fused path (clean + corrupted batched in lanes)
    out_clean, out_corrupt = enc.forward_pair(a_hat, features, k_perm)
    # streaming tiled path (the kernels used for graphs too big for VMEM)
    s_clean, s_corrupt = enc.forward_pair(a_hat, features, k_perm,
                                          force_streaming=True)
    # single-input call, matching the PyTorch Encoder API
    out_single = enc(a_hat, features, corrupt=False)
    jax.block_until_ready((out_clean, out_corrupt, s_clean, s_corrupt, out_single))

    assert out_clean.shape == (N, n_hidden)
    assert out_corrupt.shape == (N, n_hidden)
    assert bool(jnp.all(jnp.isfinite(out_clean)))
    assert bool(jnp.all(jnp.isfinite(out_corrupt)))

    # resident / streaming / single-call paths must agree (all bf16-MXU)
    assert float(jnp.max(jnp.abs(out_clean - s_clean))) < 2e-2
    assert float(jnp.max(jnp.abs(out_corrupt - s_corrupt))) < 2e-2
    assert float(jnp.max(jnp.abs(out_single - out_clean))) < 2e-2

    # compare against the f32 reference (bf16 MXU inputs -> loose tolerance)
    perm = jax.random.permutation(k_perm, N)
    ref_clean = reference_encoder(a_hat, features, enc.logical_layers)
    ref_corrupt = reference_encoder(a_hat, features[perm], enc.logical_layers)
    assert float(jnp.max(jnp.abs(out_clean - ref_clean))) < 5e-2
    assert float(jnp.max(jnp.abs(out_corrupt - ref_corrupt))) < 5e-2
    assert float(jnp.max(jnp.abs(s_clean - ref_clean))) < 5e-2
    assert float(jnp.max(jnp.abs(s_corrupt - ref_corrupt))) < 5e-2

    print("KERNEL_OK")
</pallas_src>

<mosaic_0001>
module attributes {stable_mosaic.version = 11 : i64} {
  func.func @_stack_kernel(%arg0: memref<128x128xbf16, #tpu.memory_space<vmem>>, %arg1: memref<128x512xbf16, #tpu.memory_space<vmem>>, %arg2: memref<256x128xbf16, #tpu.memory_space<vmem>>, %arg3: memref<1x128xf32, #tpu.memory_space<vmem>>, %arg4: memref<1x128xf32, #tpu.memory_space<vmem>>, %arg5: memref<128x128xbf16, #tpu.memory_space<vmem>>, %arg6: memref<1x128xf32, #tpu.memory_space<vmem>>, %arg7: memref<128x256xf32, #tpu.memory_space<vmem>>) attributes {dimension_semantics = [], scalar_prefetch = 0 : i64, scratch_operands = 0 : i64, tpu.core_type = #tpu.core_type<tc>} {
    %c0 = arith.constant 0 : index
    %c0_0 = arith.constant 0 : index
    %0 = vector.load %arg0[%c0, %c0_0] : memref<128x128xbf16, #tpu.memory_space<vmem>>, vector<128x128xbf16>
    %c0_1 = arith.constant 0 : index
    %c0_2 = arith.constant 0 : index
    %1 = vector.load %arg1[%c0_1, %c0_2] : memref<128x512xbf16, #tpu.memory_space<vmem>>, vector<128x256xbf16>
    %c0_3 = arith.constant 0 : index
    %c256 = arith.constant 256 : index
    %2 = vector.load %arg1[%c0_3, %c256] : memref<128x512xbf16, #tpu.memory_space<vmem>>, vector<128x256xbf16>
    %c0_4 = arith.constant 0 : index
    %c0_5 = arith.constant 0 : index
    %3 = vector.load %arg2[%c0_4, %c0_5] : memref<256x128xbf16, #tpu.memory_space<vmem>>, vector<256x128xbf16>
    %c0_6 = arith.constant 0 : index
    %c0_7 = arith.constant 0 : index
    %4 = vector.load %arg3[%c0_6, %c0_7] : memref<1x128xf32, #tpu.memory_space<vmem>>, vector<1x128xf32>
    %c0_8 = arith.constant 0 : index
    %c0_9 = arith.constant 0 : index
    %5 = vector.load %arg4[%c0_8, %c0_9] : memref<1x128xf32, #tpu.memory_space<vmem>>, vector<1x128xf32>
    %cst = arith.constant dense<0.000000e+00> : vector<128x128xf32>
    %6 = tpu.matmul %1, %3, %cst {dimension_numbers = #tpu.dot_dimension_numbers<[1], [0], [0], [1], [0, 0, 1, 1], [], []>} : vector<128x256xbf16>, vector<256x128xbf16>, vector<128x128xf32> -> vector<128x128xf32>
    %7 = arith.truncf %6 : vector<128x128xf32> to vector<128x128xbf16>
    %cst_10 = arith.constant dense<0.000000e+00> : vector<128x128xf32>
    %8 = tpu.matmul %0, %7, %cst_10 {dimension_numbers = #tpu.dot_dimension_numbers<[1], [0], [0], [1], [0, 0, 1, 1], [], []>} : vector<128x128xbf16>, vector<128x128xbf16>, vector<128x128xf32> -> vector<128x128xf32>
    %9 = vector.broadcast %4 : vector<1x128xf32> to vector<128x128xf32>
    %10 = arith.addf %8, %9 : vector<128x128xf32>
    %cst_11 = arith.constant 0.000000e+00 : f32
    %11 = vector.broadcast %cst_11 : f32 to vector<128x128xf32>
    %12 = arith.cmpf oge, %10, %11 : vector<128x128xf32>
    %13 = vector.broadcast %5 : vector<1x128xf32> to vector<128x128xf32>
    %14 = arith.mulf %13, %10 : vector<128x128xf32>
    %15 = arith.select %12, %10, %14 : vector<128x128xi1>, vector<128x128xf32>
    %16 = arith.truncf %15 : vector<128x128xf32> to vector<128x128xbf16>
    %cst_12 = arith.constant dense<0.000000e+00> : vector<128x128xf32>
    %17 = tpu.matmul %2, %3, %cst_12 {dimension_numbers = #tpu.dot_dimension_numbers<[1], [0], [0], [1], [0, 0, 1, 1], [], []>} : vector<128x256xbf16>, vector<256x128xbf16>, vector<128x128xf32> -> vector<128x128xf32>
    %18 = arith.truncf %17 : vector<128x128xf32> to vector<128x128xbf16>
    %cst_13 = arith.constant dense<0.000000e+00> : vector<128x128xf32>
    %19 = tpu.matmul %0, %18, %cst_13 {dimension_numbers = #tpu.dot_dimension_numbers<[1], [0], [0], [1], [0, 0, 1, 1], [], []>} : vector<128x128xbf16>, vector<128x128xbf16>, vector<128x128xf32> -> vector<128x128xf32>
    %20 = vector.broadcast %4 : vector<1x128xf32> to vector<128x128xf32>
    %21 = arith.addf %19, %20 : vector<128x128xf32>
    %cst_14 = arith.constant 0.000000e+00 : f32
    %22 = vector.broadcast %cst_14 : f32 to vector<128x128xf32>
    %23 = arith.cmpf oge, %21, %22 : vector<128x128xf32>
    %24 = vector.broadcast %5 : vector<1x128xf32> to vector<128x128xf32>
    %25 = arith.mulf %24, %21 : vector<128x128xf32>
    %26 = arith.select %23, %21, %25 : vector<128x128xi1>, vector<128x128xf32>
    %27 = arith.truncf %26 : vector<128x128xf32> to vector<128x128xbf16>
    %c0_15 = arith.constant 0 : index
    %c0_16 = arith.constant 0 : index
    %28 = vector.load %arg5[%c0_15, %c0_16] : memref<128x128xbf16, #tpu.memory_space<vmem>>, vector<128x128xbf16>
    %c0_17 = arith.constant 0 : index
    %c0_18 = arith.constant 0 : index
    %29 = vector.load %arg6[%c0_17, %c0_18] : memref<1x128xf32, #tpu.memory_space<vmem>>, vector<1x128xf32>
    %cst_19 = arith.constant dense<0.000000e+00> : vector<128x128xf32>
    %30 = tpu.matmul %0, %16, %cst_19 {dimension_numbers = #tpu.dot_dimension_numbers<[1], [0], [0], [1], [0, 0, 1, 1], [], []>} : vector<128x128xbf16>, vector<128x128xbf16>, vector<128x128xf32> -> vector<128x128xf32>
    %31 = arith.truncf %30 : vector<128x128xf32> to vector<128x128xbf16>
    %cst_20 = arith.constant dense<0.000000e+00> : vector<128x128xf32>
    %32 = tpu.matmul %31, %28, %cst_20 {dimension_numbers = #tpu.dot_dimension_numbers<[1], [0], [0], [1], [0, 0, 1, 1], [], []>} : vector<128x128xbf16>, vector<128x128xbf16>, vector<128x128xf32> -> vector<128x128xf32>
    %33 = vector.broadcast %29 : vector<1x128xf32> to vector<128x128xf32>
    %34 = arith.addf %32, %33 : vector<128x128xf32>
    %cst_21 = arith.constant dense<0.000000e+00> : vector<128x128xf32>
    %35 = tpu.matmul %0, %27, %cst_21 {dimension_numbers = #tpu.dot_dimension_numbers<[1], [0], [0], [1], [0, 0, 1, 1], [], []>} : vector<128x128xbf16>, vector<128x128xbf16>, vector<128x128xf32> -> vector<128x128xf32>
    %36 = arith.truncf %35 : vector<128x128xf32> to vector<128x128xbf16>
    %cst_22 = arith.constant dense<0.000000e+00> : vector<128x128xf32>
    %37 = tpu.matmul %36, %28, %cst_22 {dimension_numbers = #tpu.dot_dimension_numbers<[1], [0], [0], [1], [0, 0, 1, 1], [], []>} : vector<128x128xbf16>, vector<128x128xbf16>, vector<128x128xf32> -> vector<128x128xf32>
    %38 = vector.broadcast %29 : vector<1x128xf32> to vector<128x128xf32>
    %39 = arith.addf %37, %38 : vector<128x128xf32>
    %c0_23 = arith.constant 0 : index
    %c0_24 = arith.constant 0 : index
    %40 = vector.load %arg7[%c0_23, %c0_24] : memref<128x256xf32, #tpu.memory_space<vmem>>, vector<128x128xf32>
    tpu.vector_store %arg7[%c0_23, %c0_24], %34 {strides = array<i32>} : memref<128x256xf32, #tpu.memory_space<vmem>>, vector<128x128xf32>,
    %c0_25 = arith.constant 0 : index
    %c128 = arith.constant 128 : index
    %41 = vector.load %arg7[%c0_25, %c128] : memref<128x256xf32, #tpu.memory_space<vmem>>, vector<128x128xf32>
    tpu.vector_store %arg7[%c0_25, %c128], %39 {strides = array<i32>} : memref<128x256xf32, #tpu.memory_space<vmem>>, vector<128x128xf32>,
    return
  }
}

</mosaic_0001>

<bundles_post_ra>
// kernel: tpu_custom_call.1
= control target key start
LH: loop header
LB: loop body
LE: loop exit
PB: predicated region body
PF: predicated region fallthrough
CT: control target
= control target key end

     0   :  { %12 = vsyncpa [#allocation3], 0  ;;  %s2647_s0 = inlined_call_operand.hbm [shape: bf16[128,128], index: 0, kind: input, shape index: {}]   ;;  %s2648_s1 = inlined_call_operand.hbm [shape: bf16[128,512], index: 1, kind: input, shape index: {}]   ;;  %s2649_s2 = inlined_call_operand.hbm [shape: bf16[256,128], index: 2, kind: input, shape index: {}]   ;;  %s2650_s3 = inlined_call_operand.vmem [shape: f32[1,128], index: 3, kind: input, shape index: {}]   ;;  %s2651_s4 = inlined_call_operand.vmem [shape: f32[1,128], index: 4, kind: input, shape index: {}]   ;;  %s2652_s5 = inlined_call_operand.hbm [shape: bf16[128,128], index: 5, kind: input, shape index: {}]   ;;  %s2653_s6 = inlined_call_operand.vmem [shape: f32[1,128], index: 6, kind: input, shape index: {}]   ;;  %s2654_s7 = inlined_call_operand.hbm [shape: f32[128,256], index: 7, kind: output, shape index: {}]  }
   0x1   :  { %13 = vsyncpa [#allocation6], 0 }
   0x2   :  { %14 = vsyncpa [#allocation9], 0 }
   0x3   :  { %15 = vsyncpa [#allocation4], 0  ;;  %s2213_s24 = smov [#allocation5]   ;;  %s2095_s28 = scalar_lea.hbm %s2648_s1, 4096 }
   0x4   :  { %s33_s25 = sshll.u32 %s2213_s24, 4  ;;  %p2096_p0 = scmp.ne.s32.totalorder %s2648_s1, %s2095_s28  ;;  %s34_s25 = int_to_ptr.vmem [resolvable:$true] %s33_s25 }
   0x5   :  { %p2099_p1 = scmp.lt.u32.totalorder %s2095_s28, %s2648_s1 }
   0x7   :  { %p2101_p2 = pnand %p2099_p1, %p2096_p0 }
   0x9   :  { %2104 = shalt.err (!%p2101_p2)
}
   0xa   :  { %s2105_s10 = scalar_lea.vmem %s34_s25, 4096  ;;  %p2110_p4 = scmp.lt.s32.totalorder %s34_s25, %s34_s25 }
   0xb   :  { %p2106_p3 = scmp.ne.s32.totalorder %s34_s25, %s2105_s10  ;;  %p2111_p5 = scmp.lt.s32.totalorder %s2105_s10, %s2105_s10 }
   0xd   :  { %p2112_p6 = por %p2111_p5, %p2110_p4 }
   0xf   :  { %p2113_p7 = pnand %p2112_p6, %p2106_p3 }
  0x11   :  { %2116 = shalt.err (!%p2113_p7)
}
  0x12   :  { %s2214_s11 = smov 256   ;;  %s2215_s12 = smov 16  }
  0x13   :  { %39 = dma.hbm_to_vmem [thread:$0]  %s2648_s1, 4096, %s34_s25, [#allocation6], %s2214_s11, %s2214_s11, %s2215_s12  }
  0x14   :  { %s2216_s15 = smov [#allocation2]   ;;  %s2117_s19 = scalar_lea.hbm %s2647_s0, 1024 }
  0x15   :  { %s21_s16 = sshll.u32 %s2216_s15, 4  ;;  %p2118_p8 = scmp.ne.s32.totalorder %s2647_s0, %s2117_s19  ;;  %s22_s16 = int_to_ptr.vmem [resolvable:$true] %s21_s16 }
  0x16   :  { %p2121_p9 = scmp.lt.u32.totalorder %s2117_s19, %s2647_s0 }
  0x18   :  { %p2123_p10 = pnand %p2121_p9, %p2118_p8 }
  0x1a   :  { %2126 = shalt.err (!%p2123_p10)
}
  0x1b   :  { %s2127_s24 = scalar_lea.vmem %s22_s16, 1024  ;;  %p2132_p12 = scmp.lt.s32.totalorder %s22_s16, %s22_s16 }
  0x1c   :  { %p2128_p11 = scmp.ne.s32.totalorder %s22_s16, %s2127_s24  ;;  %p2133_p13 = scmp.lt.s32.totalorder %s2127_s24, %s2127_s24 }
  0x1e   :  { %p2134_p0 = por %p2133_p13, %p2132_p12 }
  0x20   :  { %p2135_p1 = pnand %p2134_p0, %p2128_p11 }
  0x22   :  { %2138 = shalt.err (!%p2135_p1)
}
  0x23   :  { %s2217_s1 = smov 64   ;;  %s2218_s25 = smov 4  }
  0x24   :  { %27 = dma.hbm_to_vmem [thread:$0]  %s2647_s0, 1024, %s22_s16, [#allocation3], %s2217_s1, %s2217_s1, %s2218_s25  }
  0x25   :  { %s2219_s28 = smov [#allocation7]   ;;  %s2220_s30 = smov [#allocation8]  }
  0x26   :  { %s45_s29 = sshll.u32 %s2219_s28, 4  ;;  %s61_s8 = sshll.u32 %s2220_s30, 4  ;;  %s46_s29 = int_to_ptr.vmem [resolvable:$true] %s45_s29  ;;  %s2292_s8 = int_to_ptr.vmem [resolvable:$true] %s61_s8 }
  0x27   :  { %s2139_s13 = scalar_lea.hbm %s2649_s2, 2048 }
  0x28   :  { %p2140_p2 = scmp.ne.s32.totalorder %s2649_s2, %s2139_s13  ;;  %p2143_p3 = scmp.lt.u32.totalorder %s2139_s13, %s2649_s2 }
  0x2a   :  { %p2145_p4 = pnand %p2143_p3, %p2140_p2 }
  0x2c   :  { %2148 = shalt.err (!%p2145_p4)
}
  0x2d   :  { %s2149_s0 = scalar_lea.vmem %s46_s29, 2048  ;;  %p2154_p6 = scmp.lt.s32.totalorder %s46_s29, %s46_s29 }
  0x2e   :  { %p2150_p5 = scmp.ne.s32.totalorder %s46_s29, %s2149_s0  ;;  %p2155_p7 = scmp.lt.s32.totalorder %s2149_s0, %s2149_s0 }
  0x30   :  { %p2156_p8 = por %p2155_p7, %p2154_p6 }
  0x32   :  { %p2157_p9 = pnand %p2156_p8, %p2150_p5 }
  0x34   :  { %2160 = shalt.err (!%p2157_p9)
}
  0x35   :  { %51 = dma.hbm_to_vmem [thread:$0]  %s2649_s2, 2048, %s46_s29, [#allocation6], %s2217_s1, %s2217_s1, %s2218_s25  }
  0x36   :  { %s2161_s22 = scalar_lea.hbm %s2652_s5, 1024 }
  0x37   :  { %p2162_p10 = scmp.ne.s32.totalorder %s2652_s5, %s2161_s22  ;;  %p2165_p11 = scmp.lt.u32.totalorder %s2161_s22, %s2652_s5 }
  0x39   :  { %p2167_p12 = pnand %p2165_p11, %p2162_p10 }
  0x3b   :  { %2170 = shalt.err (!%p2167_p12)
}
  0x3c   :  { %s2171_s28 = scalar_lea.vmem %s2292_s8, 1024  ;;  %p2176_p0 = scmp.lt.s32.totalorder %s2292_s8, %s2292_s8 }
  0x3d   :  { %p2172_p13 = scmp.ne.s32.totalorder %s2292_s8, %s2171_s28  ;;  %p2177_p1 = scmp.lt.s32.totalorder %s2171_s28, %s2171_s28 }
  0x3f   :  { %p2178_p2 = por %p2177_p1, %p2176_p0 }
  0x41   :  { %p2179_p3 = pnand %p2178_p2, %p2172_p13 }
  0x43   :  { %2182 = shalt.err (!%p2179_p3)
}
  0x44   :  { %67 = dma.hbm_to_vmem [thread:$0]  %s2652_s5, 1024, %s2292_s8, [#allocation9], %s2217_s1, %s2217_s1, %s2218_s25  }
  0x45   :  { %2205 = dma.done.wait [#allocation3], 1024  }
  0x46   :  { %2206 = vsyncadd [#allocation3], 4294966272 }
  0x47   :  { %2207 = dma.done.wait [#allocation6], 6144  }
  0x48   :  { %2208 = vsyncadd [#allocation6], 4294961152 }
  0x49   :  { %2209 = dma.done.wait [#allocation9], 1024  }
  0x4a   :  { %2210 = vsyncadd [#allocation9], 4294966272  ;;  %v2329_v0 = vld [vmem:[#allocation7 + $0x40] sm:$0xff]   ;;  %v2334_v2 = vld [vmem:[#allocation7 + $0x48] sm:$0xff]  }
  0x4b   :  { %v2331_v1 = vld [vmem:[#allocation7] sm:$0xff]   ;;  %1590 = vmatprep.subr.bf16.mxu0 %v2329_v0  ;;  %v2337_v3 = vld [vmem:[#allocation7 + $0x8] sm:$0xff]   ;;  %v2340_v4 = vld [vmem:[#allocation7 + $0x50] sm:$0xff]  }
  0x4c   :  { %1591 = vmatpush3.bf16.msra.mxu0 %v2331_v1  ;;  %v2343_v5 = vld [vmem:[#allocation7 + $0x10] sm:$0xff]   ;;  %v2346_v6 = vld [vmem:[#allocation7 + $0x58] sm:$0xff]   ;;  %v2352_v8 = vld [vmem:[#allocation7 + $0x60] sm:$0xff]  }
  0x4d   :  { %1592 = vmatprep.subr.bf16.mxu0 %v2334_v2  ;;  %v2349_v7 = vld [vmem:[#allocation7 + $0x18] sm:$0xff]   ;;  %v2355_v9 = vld [vmem:[#allocation7 + $0x20] sm:$0xff]   ;;  %v2358_v10 = vld [vmem:[#allocation7 + $0x68] sm:$0xff]  }
  0x4e   :  { %v2033_v11 = vld [vmem:[#allocation5 + $0x4] ss:$16 sps:$4 sm:$0xff]   ;;  %v2361_v12 = vld [vmem:[#allocation7 + $0x28] sm:$0xff]   ;;  %v2370_v15 = vld [vmem:[#allocation7 + $0x78] sm:$0xff]  }
  0x4f   :  { %373 = vmatprep.mubr.bf16.mxu0 %v2033_v11  ;;  %v2364_v13 = vld [vmem:[#allocation7 + $0x70] sm:$0xff]   ;;  %v2372_v16 = vld [vmem:[#allocation7 + $0x38] sm:$0xff]   ;;  %v2377_v32 = vld [vmem:[#allocation2] sm:$0xff]  }
  0x50   :  { %1593 = vmatpush3.bf16.msra.mxu0 %v2337_v3  ;;  %v2367_v14 = vld [vmem:[#allocation7 + $0x30] sm:$0xff]   ;;  %1830 = vmatprep.mubr.bf16.mxu1 %v2377_v32 }
  0x51   :  { %1594 = vmatprep.subr.bf16.mxu0 %v2340_v4  ;;  %v2031_v17 = vld [vmem:[#allocation5] ss:$16 sps:$4 sm:$0xff]   ;;  %v2034_v18 = vld [vmem:[#allocation5 + $0x24] ss:$16 sps:$4 sm:$0xff]  }
  0x52   :  { %v2036_v19 = vld [vmem:[#allocation5 + $0x20] ss:$16 sps:$4 sm:$0xff]   ;;  %v2037_v20 = vld [vmem:[#allocation5 + $0x44] ss:$16 sps:$4 sm:$0xff]  }
  0x53   :  { %v2039_v21 = vld [vmem:[#allocation5 + $0x40] ss:$16 sps:$4 sm:$0xff]   ;;  %v2040_v22 = vld [vmem:[#allocation5 + $0x64] ss:$16 sps:$4 sm:$0xff]  }
  0x54   :  { %1595 = vmatpush3.bf16.msra.mxu0 %v2343_v5  ;;  %v2042_v23 = vld [vmem:[#allocation5 + $0x60] ss:$16 sps:$4 sm:$0xff]   ;;  %v2043_v24 = vld [vmem:[#allocation5 + $0x84] ss:$16 sps:$4 sm:$0xff]  }
  0x55   :  { %1596 = vmatprep.subr.bf16.mxu0 %v2346_v6  ;;  %v2045_v25 = vld [vmem:[#allocation5 + $0x80] ss:$16 sps:$4 sm:$0xff]   ;;  %v2046_v26 = vld [vmem:[#allocation5 + $0xa4] ss:$16 sps:$4 sm:$0xff]  }
  0x56   :  { %v2048_v27 = vld [vmem:[#allocation5 + $0xa0] ss:$16 sps:$4 sm:$0xff]   ;;  %v2049_v28 = vld [vmem:[#allocation5 + $0xc4] ss:$16 sps:$4 sm:$0xff]  }
  0x57   :  { %v2051_v29 = vld [vmem:[#allocation5 + $0xc0] ss:$16 sps:$4 sm:$0xff]   ;;  %v2052_v30 = vld [vmem:[#allocation5 + $0xe4] ss:$16 sps:$4 sm:$0xff]  }
  0x58   :  { %1597 = vmatpush3.bf16.msra.mxu0 %v2349_v7  ;;  %v2054_v31 = vld [vmem:[#allocation5 + $0xe0] ss:$16 sps:$4 sm:$0xff]  }
  0x59   :  { %1598 = vmatprep.subr.bf16.mxu0 %v2352_v8 }
  0x5c   :  { %1599 = vmatpush3.bf16.msra.mxu0 %v2355_v9 }
  0x5d   :  { %1600 = vmatprep.subr.bf16.mxu0 %v2358_v10 }
  0x60   :  { %1601 = vmatpush3.bf16.msra.mxu0 %v2361_v12 }
  0x61   :  { %1602 = vmatprep.subr.bf16.mxu0 %v2364_v13 }
  0x64   :  { %1603 = vmatpush3.bf16.msra.mxu0 %v2367_v14 }
  0x65   :  { %1604 = vmatprep.subr.bf16.mxu0 %v2370_v15 }
  0x68   :  { %1605 = vmatpush3.bf16.msra.mxu0 %v2372_v16 }
  0x6b   :  { %374 = vmatmul.mubr.bf16.vlgmr.msra.gmra.mrb[0].mxu0 %v2031_v17 }
  0x6c   :  { %381 = vmatprep.mubr.bf16.mxu0 %v2034_v18 }
  0x73   :  { %382 = vmatmul.mubr.bf16.gmra.mrb[4].mxu0 %v2036_v19 }
  0x74   :  { %389 = vmatprep.mubr.bf16.mxu0 %v2037_v20 }
  0x7b   :  { %390 = vmatmul.mubr.bf16.gmra.mrb[8].mxu0 %v2039_v21 }
  0x7c   :  { %397 = vmatprep.mubr.bf16.mxu0 %v2040_v22 }
  0x83   :  { %398 = vmatmul.mubr.bf16.gmra.mrb[12].mxu0 %v2042_v23 }
  0x84   :  { %405 = vmatprep.mubr.bf16.mxu0 %v2043_v24 }
  0x8b   :  { %406 = vmatmul.mubr.bf16.gmra.mrb[16].mxu0 %v2045_v25 }
  0x8c   :  { %413 = vmatprep.mubr.bf16.mxu0 %v2046_v26 }
  0x93   :  { %414 = vmatmul.mubr.bf16.gmra.mrb[20].mxu0 %v2048_v27 }
  0x94   :  { %421 = vmatprep.mubr.bf16.mxu0 %v2049_v28 }
  0x9b   :  { %422 = vmatmul.mubr.bf16.gmra.mrb[24].mxu0 %v2051_v29 }
  0x9c   :  { %429 = vmatprep.mubr.bf16.mxu0 %v2052_v30 }
  0xa3   :  { %430 = vmatmul.mubr.bf16.gmra.mrb[28].mxu0 %v2054_v31 }
  0xa4   :  { %1862 = vmatprep.mubr.bf16.mxu0 %v2377_v32 }
 0x13e   :  { %v1606_v33 = vpop.f32.mrb[0].mxu0 }
 0x13f   :  { %v1607_v34 = vpop.f32.mrb[1].mxu0 }
 0x140   :  { %v1608_v35 = vadd.f32 %v1607_v34, %v1606_v33  ;;  %v1609_v36 = vpop.f32.mrb[2].mxu0 }
 0x141   :  { %v1610_v37 = vpop.f32.mrb[3].mxu0 }
 0x142   :  { %v1611_v38 = vadd.f32 %v1610_v37, %v1609_v36 }
 0x144   :  { %v438_v39 = vpack.c.bf16 %v1611_v38, %v1608_v35 }
 0x146   :  { %v1612_v40 = vpop.f32.mrb[4].mxu0  ;;  %1814 = vmatprep.subr.bf16.mxu1 %v438_v39 }
 0x147   :  { %v1613_v41 = vpop.f32.mrb[5].mxu0  ;;  %1815 = vmatpush3.bf16.msra.mxu1 %v438_v39 }
 0x148   :  { %v1614_v42 = vadd.f32 %v1613_v41, %v1612_v40  ;;  %v1615_v43 = vpop.f32.mrb[6].mxu0 }
 0x149   :  { %v1616_v44 = vpop.f32.mrb[7].mxu0 }
 0x14a   :  { %v1617_v45 = vadd.f32 %v1616_v44, %v1615_v43  ;;  %v2383_v43 = vld [vmem:[#allocation2 + $0x10] sm:$0xff]   ;;  %v2390_v44 = vld [vmem:[#allocation2 + $0x18] sm:$0xff]  }
 0x14c   :  { %v439_v46 = vpack.c.bf16 %v1617_v45, %v1614_v42  ;;  %v2381_v42 = vld [vmem:[#allocation2 + $0x8] sm:$0xff]   ;;  %v2393_v45 = vld [vmem:[#allocation2 + $0x20] sm:$0xff]  }
 0x14e   :  { %v1618_v47 = vpop.f32.mrb[8].mxu0  ;;  %1816 = vmatprep.subr.bf16.mxu1 %v439_v46 }
 0x14f   :  { %v1619_v48 = vpop.f32.mrb[9].mxu0  ;;  %1817 = vmatpush3.bf16.msra.mxu1 %v439_v46  ;;  %v2083_v46 = vld [vmem:[#allocation5 + $0xc8] ss:$16 sps:$4 sm:$0xff]  }
 0x150   :  { %v1620_v49 = vadd.f32 %v1619_v48, %v1618_v47  ;;  %v1621_v50 = vpop.f32.mrb[10].mxu0  ;;  %v2084_v47 = vld [vmem:[#allocation5 + $0xec] ss:$16 sps:$4 sm:$0xff]   ;;  %v2086_v48 = vld [vmem:[#allocation5 + $0xe8] ss:$16 sps:$4 sm:$0xff]  }
 0x151   :  { %v1622_v51 = vpop.f32.mrb[11].mxu0 }
 0x152   :  { %v1623_v52 = vadd.f32 %v1622_v51, %v1621_v50  ;;  %v2426_v50 = vld [vmem:[%s2651_s4] ss:$0 sm:$0xff] }
 0x154   :  { %v440_v53 = vpack.c.bf16 %v1623_v52, %v1620_v49  ;;  %v2421_v49 = vld [vmem:[%s2650_s3] ss:$0 sm:$0xff] }
 0x156   :  { %v1624_v54 = vpop.f32.mrb[12].mxu0  ;;  %1818 = vmatprep.subr.bf16.mxu1 %v440_v53 }
 0x157   :  { %v1625_v55 = vpop.f32.mrb[13].mxu0  ;;  %1819 = vmatpush3.bf16.msra.mxu1 %v440_v53 }
 0x158   :  { %v1626_v56 = vadd.f32 %v1625_v55, %v1624_v54  ;;  %v1627_v57 = vpop.f32.mrb[14].mxu0 }
 0x159   :  { %v1628_v58 = vpop.f32.mrb[15].mxu0 }
 0x15a   :  { %v1629_v59 = vadd.f32 %v1628_v58, %v1627_v57 }
 0x15c   :  { %v441_v60 = vpack.c.bf16 %v1629_v59, %v1626_v56 }
 0x15e   :  { %v1630_v61 = vpop.f32.mrb[16].mxu0  ;;  %1820 = vmatprep.subr.bf16.mxu1 %v441_v60 }
 0x15f   :  { %v1631_v62 = vpop.f32.mrb[17].mxu0  ;;  %1821 = vmatpush3.bf16.msra.mxu1 %v441_v60 }
 0x160   :  { %v1632_v63 = vadd.f32 %v1631_v62, %v1630_v61  ;;  %v1633_v11 = vpop.f32.mrb[18].mxu0 }
 0x161   :  { %v1634_v17 = vpop.f32.mrb[19].mxu0 }
 0x162   :  { %v1635_v18 = vadd.f32 %v1634_v17, %v1633_v11 }
 0x164   :  { %v442_v19 = vpack.c.bf16 %v1635_v18, %v1632_v63 }
 0x166   :  { %v1636_v20 = vpop.f32.mrb[20].mxu0  ;;  %1822 = vmatprep.subr.bf16.mxu1 %v442_v19 }
 0x167   :  { %v1637_v21 = vpop.f32.mrb[21].mxu0  ;;  %1823 = vmatpush3.bf16.msra.mxu1 %v442_v19 }
 0x168   :  { %v1638_v22 = vadd.f32 %v1637_v21, %v1636_v20  ;;  %v1639_v23 = vpop.f32.mrb[22].mxu0 }
 0x169   :  { %v1640_v24 = vpop.f32.mrb[23].mxu0 }
 0x16a   :  { %v1641_v25 = vadd.f32 %v1640_v24, %v1639_v23 }
 0x16c   :  { %v443_v26 = vpack.c.bf16 %v1641_v25, %v1638_v22 }
 0x16e   :  { %v1642_v27 = vpop.f32.mrb[24].mxu0  ;;  %1824 = vmatprep.subr.bf16.mxu1 %v443_v26 }
 0x16f   :  { %v1643_v28 = vpop.f32.mrb[25].mxu0  ;;  %1825 = vmatpush3.bf16.msra.mxu1 %v443_v26 }
 0x170   :  { %v1644_v29 = vadd.f32 %v1643_v28, %v1642_v27  ;;  %v1645_v30 = vpop.f32.mrb[26].mxu0 }
 0x171   :  { %v1646_v31 = vpop.f32.mrb[27].mxu0 }
 0x172   :  { %v1647_v33 = vadd.f32 %v1646_v31, %v1645_v30 }
 0x174   :  { %v444_v34 = vpack.c.bf16 %v1647_v33, %v1644_v29 }
 0x176   :  { %v1648_v35 = vpop.f32.mrb[28].mxu0  ;;  %1826 = vmatprep.subr.bf16.mxu1 %v444_v34 }
 0x177   :  { %v1649_v36 = vpop.f32.mrb[29].mxu0  ;;  %1827 = vmatpush3.bf16.msra.mxu1 %v444_v34 }
 0x178   :  { %v1650_v37 = vadd.f32 %v1649_v36, %v1648_v35  ;;  %v1651_v38 = vpop.f32.mrb[30].mxu0 }
 0x179   :  { %v1652_v39 = vpop.f32.mrb[31].mxu0 }
 0x17a   :  { %v1653_v40 = vadd.f32 %v1652_v39, %v1651_v38 }
 0x17c   :  { %v445_v41 = vpack.c.bf16 %v1653_v40, %v1650_v37 }
 0x17e   :  { %1828 = vmatprep.subr.bf16.mxu1 %v445_v41 }
 0x17f   :  { %1829 = vmatpush3.bf16.msra.mxu1 %v445_v41 }
 0x180   :  { %1670 = vmatprep.subr.bf16.mxu1 %v2329_v0  ;;  %v2400_v0 = vld [vmem:[#allocation2 + $0x28] sm:$0xff]  }
 0x182   :  { %1831 = vmatmul.mubr.bf16.vlgmr.msra.gmra.mrb[0].mxu1 %v2381_v42 }
 0x183   :  { %1671 = vmatpush3.bf16.msra.mxu1 %v2331_v1  ;;  %1834 = vmatprep.mubr.bf16.mxu1 %v2383_v43  ;;  %v2403_v1 = vld [vmem:[#allocation2 + $0x30] sm:$0xff]  }
 0x184   :  { %1672 = vmatprep.subr.bf16.mxu1 %v2334_v2  ;;  %v2410_v2 = vld [vmem:[#allocation2 + $0x38] sm:$0xff]  }
 0x187   :  { %1673 = vmatpush3.bf16.msra.mxu1 %v2337_v3  ;;  %v2065_v3 = vld [vmem:[#allocation5 + $0xc] ss:$16 sps:$4 sm:$0xff]  }
 0x188   :  { %1674 = vmatprep.subr.bf16.mxu1 %v2340_v4  ;;  %v2063_v4 = vld [vmem:[#allocation5 + $0x8] ss:$16 sps:$4 sm:$0xff]  }
 0x18a   :  { %1835 = vmatmul.mubr.bf16.gmra.mrb[4].mxu1 %v2390_v44 }
 0x18b   :  { %1675 = vmatpush3.bf16.msra.mxu1 %v2343_v5  ;;  %1838 = vmatprep.mubr.bf16.mxu1 %v2393_v45  ;;  %v2066_v5 = vld [vmem:[#allocation5 + $0x2c] ss:$16 sps:$4 sm:$0xff]  }
 0x18c   :  { %1676 = vmatprep.subr.bf16.mxu1 %v2346_v6  ;;  %v2068_v6 = vld [vmem:[#allocation5 + $0x28] ss:$16 sps:$4 sm:$0xff]  }
 0x18f   :  { %1677 = vmatpush3.bf16.msra.mxu1 %v2349_v7  ;;  %v2069_v7 = vld [vmem:[#allocation5 + $0x4c] ss:$16 sps:$4 sm:$0xff]  }
 0x190   :  { %1678 = vmatprep.subr.bf16.mxu1 %v2352_v8  ;;  %v2071_v8 = vld [vmem:[#allocation5 + $0x48] ss:$16 sps:$4 sm:$0xff]  }
 0x192   :  { %1839 = vmatmul.mubr.bf16.gmra.mrb[8].mxu1 %v2400_v0 }
 0x193   :  { %1679 = vmatpush3.bf16.msra.mxu1 %v2355_v9  ;;  %1842 = vmatprep.mubr.bf16.mxu1 %v2403_v1  ;;  %v2072_v9 = vld [vmem:[#allocation5 + $0x6c] ss:$16 sps:$4 sm:$0xff]  }
 0x194   :  { %1680 = vmatprep.subr.bf16.mxu1 %v2358_v10  ;;  %v2074_v10 = vld [vmem:[#allocation5 + $0x68] ss:$16 sps:$4 sm:$0xff]  }
 0x197   :  { %1681 = vmatpush3.bf16.msra.mxu1 %v2361_v12  ;;  %v2075_v12 = vld [vmem:[#allocation5 + $0x8c] ss:$16 sps:$4 sm:$0xff]  }
 0x198   :  { %1682 = vmatprep.subr.bf16.mxu1 %v2364_v13  ;;  %v2077_v13 = vld [vmem:[#allocation5 + $0x88] ss:$16 sps:$4 sm:$0xff]  }
 0x19a   :  { %1843 = vmatmul.mubr.bf16.gmra.mrb[12].mxu1 %v2410_v2 }
 0x19b   :  { %1683 = vmatpush3.bf16.msra.mxu1 %v2367_v14  ;;  %771 = vmatprep.mubr.bf16.mxu1 %v2065_v3  ;;  %v2078_v14 = vld [vmem:[#allocation5 + $0xac] ss:$16 sps:$4 sm:$0xff]  }
 0x19c   :  { %1684 = vmatprep.subr.bf16.mxu1 %v2370_v15  ;;  %v2080_v15 = vld [vmem:[#allocation5 + $0xa8] ss:$16 sps:$4 sm:$0xff]  }
 0x19f   :  { %1685 = vmatpush3.bf16.msra.mxu1 %v2372_v16  ;;  %v2081_v16 = vld [vmem:[#allocation5 + $0xcc] ss:$16 sps:$4 sm:$0xff]  }
 0x1a2   :  { %772 = vmatmul.mubr.bf16.vlgmr.msra.gmra.mrb[16].mxu1 %v2063_v4 }
 0x1a3   :  { %779 = vmatprep.mubr.bf16.mxu1 %v2066_v5 }
 0x1aa   :  { %780 = vmatmul.mubr.bf16.gmra.mrb[20].mxu1 %v2068_v6 }
 0x1ab   :  { %787 = vmatprep.mubr.bf16.mxu1 %v2069_v7 }
 0x1b2   :  { %788 = vmatmul.mubr.bf16.gmra.mrb[24].mxu1 %v2071_v8 }
 0x1b3   :  { %795 = vmatprep.mubr.bf16.mxu1 %v2072_v9 }
 0x1ba   :  { %796 = vmatmul.mubr.bf16.gmra.mrb[28].mxu1 %v2074_v10 }
 0x1bb   :  { %803 = vmatprep.mubr.bf16.mxu1 %v2075_v12 }
 0x1c2   :  { %804 = vmatmul.mubr.bf16.gmra.mrb[32].mxu1 %v2077_v13 }
 0x1c3   :  { %811 = vmatprep.mubr.bf16.mxu1 %v2078_v14 }
 0x1ca   :  { %812 = vmatmul.mubr.bf16.gmra.mrb[36].mxu1 %v2080_v15 }
 0x1cb   :  { %819 = vmatprep.mubr.bf16.mxu1 %v2081_v16 }
 0x1d2   :  { %820 = vmatmul.mubr.bf16.gmra.mrb[40].mxu1 %v2083_v46 }
 0x1d3   :  { %827 = vmatprep.mubr.bf16.mxu1 %v2084_v47 }
 0x1da   :  { %828 = vmatmul.mubr.bf16.gmra.mrb[44].mxu1 %v2086_v48 }
 0x255   :  { %v1832_v51 = vpop.f32.mrb[0].mxu1 }
 0x256   :  { %v543_v52 = vadd.f32 %v1832_v51, %v2421_v49  ;;  %v534_v53 = vpop.f32.mrb[1].mxu1 }
 0x257   :  { %v535_v54 = vadd.f32 %v2421_v49, %v534_v53  ;;  %v1833_v55 = vpop.f32.mrb[2].mxu1 }
 0x258   :  { %v621_v56 = vmul.f32 %v2426_v50, %v543_v52  ;;  %v546_v57 = vadd.f32 %v1833_v55, %v2421_v49  ;;  %v537_v58 = vpop.f32.mrb[3].mxu1  ;;  %vm599_vm0 = vcmp.ge.f32.partialorder %v543_v52, 0.0 }
 0x259   :  { %v619_v59 = vmul.f32 %v2426_v50, %v535_v54  ;;  %v538_v60 = vadd.f32 %v2421_v49, %v537_v58  ;;  %vm597_vm1 = vcmp.ge.f32.partialorder %v535_v54, 0.0 }
 0x25a   :  { %vm600_vm2 = vcmp.ge.f32.partialorder %v546_v57, 0.0  ;;  %v622_v61 = vmul.f32 %v2426_v50, %v546_v57  ;;  %v637_v63 = vsel %vm599_vm0, %v543_v52, %v621_v56 }
 0x25b   :  { %vm598_vm3 = vcmp.ge.f32.partialorder %v538_v60, 0.0  ;;  %v620_v62 = vmul.f32 %v2426_v50, %v538_v60  ;;  %v635_v18 = vsel %vm597_vm1, %v535_v54, %v619_v59 }
 0x25c   :  { %v638_v11 = vsel %vm600_vm2, %v546_v57, %v622_v61 }
 0x25d   :  { %v1836_v17 = vpop.f32.mrb[4].mxu1  ;;  %v636_v19 = vsel %vm598_vm3, %v538_v60, %v620_v62  ;;  %v2436_v20 = vpack.c.bf16 %v638_v11, %v637_v63 }
 0x25e   :  { %v559_v21 = vadd.f32 %v1836_v17, %v2421_v49  ;;  %v550_v22 = vpop.f32.mrb[5].mxu1  ;;  %v2439_v23 = vpack.c.bf16 %v636_v19, %v635_v18 }
 0x25f   :  { %v551_v24 = vadd.f32 %v2421_v49, %v550_v22  ;;  %v1837_v25 = vpop.f32.mrb[6].mxu1 }
 0x260   :  { %v625_v26 = vmul.f32 %v2426_v50, %v559_v21  ;;  %v562_v27 = vadd.f32 %v1837_v25, %v2421_v49  ;;  %v553_v28 = vpop.f32.mrb[7].mxu1  ;;  %vm603_vm4 = vcmp.ge.f32.partialorder %v559_v21, 0.0 }
 0x261   :  { %v623_v29 = vmul.f32 %v2426_v50, %v551_v24  ;;  %v554_v30 = vadd.f32 %v2421_v49, %v553_v28  ;;  %vm601_vm5 = vcmp.ge.f32.partialorder %v551_v24, 0.0 }
 0x262   :  { %vm604_vm6 = vcmp.ge.f32.partialorder %v562_v27, 0.0  ;;  %v626_v31 = vmul.f32 %v2426_v50, %v562_v27  ;;  %v641_v34 = vsel %vm603_vm4, %v559_v21, %v625_v26 }
 0x263   :  { %vm602_vm7 = vcmp.ge.f32.partialorder %v554_v30, 0.0  ;;  %v624_v33 = vmul.f32 %v2426_v50, %v554_v30  ;;  %v639_v37 = vsel %vm601_vm5, %v551_v24, %v623_v29 }
 0x264   :  { %v642_v35 = vsel %vm604_vm6, %v562_v27, %v626_v31 }
 0x265   :  { %v1840_v36 = vpop.f32.mrb[8].mxu1  ;;  %v640_v38 = vsel %vm602_vm7, %v554_v30, %v624_v33  ;;  %v2448_v39 = vpack.c.bf16 %v642_v35, %v641_v34 }
 0x266   :  { %v575_v40 = vadd.f32 %v1840_v36, %v2421_v49  ;;  %v566_v41 = vpop.f32.mrb[9].mxu1  ;;  %v2451_v3 = vpack.c.bf16 %v640_v38, %v639_v37 }
 0x267   :  { %v567_v4 = vadd.f32 %v2421_v49, %v566_v41  ;;  %v1841_v5 = vpop.f32.mrb[10].mxu1 }
 0x268   :  { %v629_v6 = vmul.f32 %v2426_v50, %v575_v40  ;;  %v578_v7 = vadd.f32 %v1841_v5, %v2421_v49  ;;  %v569_v8 = vpop.f32.mrb[11].mxu1  ;;  %vm607_vm8 = vcmp.ge.f32.partialorder %v575_v40, 0.0 }
 0x269   :  { %v627_v9 = vmul.f32 %v2426_v50, %v567_v4  ;;  %v570_v10 = vadd.f32 %v2421_v49, %v569_v8  ;;  %vm605_vm9 = vcmp.ge.f32.partialorder %v567_v4, 0.0 }
 0x26a   :  { %vm608_vm10 = vcmp.ge.f32.partialorder %v578_v7, 0.0  ;;  %v630_v12 = vmul.f32 %v2426_v50, %v578_v7  ;;  %v645_v14 = vsel %vm607_vm8, %v575_v40, %v629_v6 }
 0x26b   :  { %vm606_vm11 = vcmp.ge.f32.partialorder %v570_v10, 0.0  ;;  %v628_v13 = vmul.f32 %v2426_v50, %v570_v10  ;;  %v643_v46 = vsel %vm605_vm9, %v567_v4, %v627_v9 }
 0x26c   :  { %v646_v15 = vsel %vm608_vm10, %v578_v7, %v630_v12 }
 0x26d   :  { %v1844_v16 = vpop.f32.mrb[12].mxu1  ;;  %v644_v47 = vsel %vm606_vm11, %v570_v10, %v628_v13  ;;  %v2460_v48 = vpack.c.bf16 %v646_v15, %v645_v14 }
 0x26e   :  { %v591_v51 = vadd.f32 %v1844_v16, %v2421_v49  ;;  %v582_v52 = vpop.f32.mrb[13].mxu1  ;;  %v2463_v53 = vpack.c.bf16 %v644_v47, %v643_v46 }
 0x26f   :  { %v583_v54 = vadd.f32 %v2421_v49, %v582_v52  ;;  %v1845_v55 = vpop.f32.mrb[14].mxu1 }
 0x270   :  { %v633_v56 = vmul.f32 %v2426_v50, %v591_v51  ;;  %v594_v57 = vadd.f32 %v1845_v55, %v2421_v49  ;;  %v585_v58 = vpop.f32.mrb[15].mxu1  ;;  %vm611_vm12 = vcmp.ge.f32.partialorder %v591_v51, 0.0 }
 0x271   :  { %v631_v59 = vmul.f32 %v2426_v50, %v583_v54  ;;  %v586_v60 = vadd.f32 %v2421_v49, %v585_v58  ;;  %vm609_vm13 = vcmp.ge.f32.partialorder %v583_v54, 0.0 }
 0x272   :  { %vm612_vm14 = vcmp.ge.f32.partialorder %v594_v57, 0.0  ;;  %v634_v61 = vmul.f32 %v2426_v50, %v594_v57  ;;  %v649_v63 = vsel %vm611_vm12, %v591_v51, %v633_v56 }
 0x273   :  { %vm610_vm15 = vcmp.ge.f32.partialorder %v586_v60, 0.0  ;;  %v632_v62 = vmul.f32 %v2426_v50, %v586_v60  ;;  %v647_v18 = vsel %vm609_vm13, %v583_v54, %v631_v59 }
 0x274   :  { %v650_v11 = vsel %vm612_vm14, %v594_v57, %v634_v61 }
 0x275   :  { %v1686_v17 = vpop.f32.mrb[16].mxu1  ;;  %v648_v19 = vsel %vm610_vm15, %v586_v60, %v632_v62  ;;  %v2472_v21 = vpack.c.bf16 %v650_v11, %v649_v63 }
 0x276   :  { %v1687_v22 = vpop.f32.mrb[17].mxu1  ;;  %v2474_v24 = vpack.c.bf16 %v648_v19, %v647_v18 }
 0x277   :  { %v1688_v25 = vadd.f32 %v1687_v22, %v1686_v17  ;;  %v1689_v26 = vpop.f32.mrb[18].mxu1 }
 0x278   :  { %v1690_v27 = vpop.f32.mrb[19].mxu1 }
 0x279   :  { %v1691_v28 = vadd.f32 %v1690_v27, %v1689_v26 }
 0x27b   :  { %v836_v29 = vpack.c.bf16 %v1691_v28, %v1688_v25 }
 0x27d   :  { %v1692_v30 = vpop.f32.mrb[20].mxu1  ;;  %1846 = vmatprep.subr.bf16.mxu0 %v836_v29 }
 0x27e   :  { %v1693_v31 = vpop.f32.mrb[21].mxu1  ;;  %1847 = vmatpush3.bf16.msra.mxu0 %v836_v29 }
 0x27f   :  { %v1694_v33 = vadd.f32 %v1693_v31, %v1692_v30  ;;  %v1695_v34 = vpop.f32.mrb[22].mxu1 }
 0x280   :  { %v1696_v35 = vpop.f32.mrb[23].mxu1 }
 0x281   :  { %v1697_v36 = vadd.f32 %v1696_v35, %v1695_v34 }
 0x283   :  { %v837_v37 = vpack.c.bf16 %v1697_v36, %v1694_v33 }
 0x285   :  { %v1698_v38 = vpop.f32.mrb[24].mxu1  ;;  %1848 = vmatprep.subr.bf16.mxu0 %v837_v37 }
 0x286   :  { %v1699_v40 = vpop.f32.mrb[25].mxu1  ;;  %1849 = vmatpush3.bf16.msra.mxu0 %v837_v37 }
 0x287   :  { %v1700_v41 = vadd.f32 %v1699_v40, %v1698_v38  ;;  %v1701_v4 = vpop.f32.mrb[26].mxu1 }
 0x288   :  { %v1702_v5 = vpop.f32.mrb[27].mxu1 }
 0x289   :  { %v1703_v6 = vadd.f32 %v1702_v5, %v1701_v4 }
 0x28b   :  { %v838_v7 = vpack.c.bf16 %v1703_v6, %v1700_v41 }
 0x28d   :  { %v1704_v8 = vpop.f32.mrb[28].mxu1  ;;  %1850 = vmatprep.subr.bf16.mxu0 %v838_v7 }
 0x28e   :  { %v1705_v9 = vpop.f32.mrb[29].mxu1  ;;  %1851 = vmatpush3.bf16.msra.mxu0 %v838_v7 }
 0x28f   :  { %v1706_v10 = vadd.f32 %v1705_v9, %v1704_v8  ;;  %v1707_v12 = vpop.f32.mrb[30].mxu1 }
 0x290   :  { %v1708_v13 = vpop.f32.mrb[31].mxu1 }
 0x291   :  { %v1709_v14 = vadd.f32 %v1708_v13, %v1707_v12 }
 0x293   :  { %v839_v15 = vpack.c.bf16 %v1709_v14, %v1706_v10 }
 0x295   :  { %v1710_v16 = vpop.f32.mrb[32].mxu1  ;;  %1852 = vmatprep.subr.bf16.mxu0 %v839_v15 }
 0x296   :  { %v1711_v46 = vpop.f32.mrb[33].mxu1  ;;  %1853 = vmatpush3.bf16.msra.mxu0 %v839_v15 }
 0x297   :  { %v1712_v47 = vadd.f32 %v1711_v46, %v1710_v16  ;;  %v1713_v51 = vpop.f32.mrb[34].mxu1 }
 0x298   :  { %v1714_v52 = vpop.f32.mrb[35].mxu1 }
 0x299   :  { %v1715_v54 = vadd.f32 %v1714_v52, %v1713_v51 }
 0x29b   :  { %v840_v55 = vpack.c.bf16 %v1715_v54, %v1712_v47 }
 0x29d   :  { %v1716_v56 = vpop.f32.mrb[36].mxu1  ;;  %1854 = vmatprep.subr.bf16.mxu0 %v840_v55 }
 0x29e   :  { %v1717_v57 = vpop.f32.mrb[37].mxu1  ;;  %1855 = vmatpush3.bf16.msra.mxu0 %v840_v55 }
 0x29f   :  { %v1718_v58 = vadd.f32 %v1717_v57, %v1716_v56  ;;  %v1719_v59 = vpop.f32.mrb[38].mxu1 }
 0x2a0   :  { %v1720_v60 = vpop.f32.mrb[39].mxu1 }
 0x2a1   :  { %v1721_v61 = vadd.f32 %v1720_v60, %v1719_v59 }
 0x2a3   :  { %v841_v62 = vpack.c.bf16 %v1721_v61, %v1718_v58 }
 0x2a5   :  { %v1722_v63 = vpop.f32.mrb[40].mxu1  ;;  %1856 = vmatprep.subr.bf16.mxu0 %v841_v62 }
 0x2a6   :  { %v1723_v11 = vpop.f32.mrb[41].mxu1  ;;  %1857 = vmatpush3.bf16.msra.mxu0 %v841_v62 }
 0x2a7   :  { %v1724_v17 = vadd.f32 %v1723_v11, %v1722_v63  ;;  %v1725_v18 = vpop.f32.mrb[42].mxu1 }
 0x2a8   :  { %v1726_v19 = vpop.f32.mrb[43].mxu1 }
 0x2a9   :  { %v1727_v22 = vadd.f32 %v1726_v19, %v1725_v18 }
 0x2ab   :  { %v842_v25 = vpack.c.bf16 %v1727_v22, %v1724_v17 }
 0x2ad   :  { %v1728_v26 = vpop.f32.mrb[44].mxu1  ;;  %1858 = vmatprep.subr.bf16.mxu0 %v842_v25 }
 0x2ae   :  { %v1729_v27 = vpop.f32.mrb[45].mxu1  ;;  %1859 = vmatpush3.bf16.msra.mxu0 %v842_v25 }
 0x2af   :  { %v1730_v28 = vadd.f32 %v1729_v27, %v1728_v26  ;;  %v1731_v29 = vpop.f32.mrb[46].mxu1 }
 0x2b0   :  { %v1732_v30 = vpop.f32.mrb[47].mxu1 }
 0x2b1   :  { %v1733_v31 = vadd.f32 %v1732_v30, %v1731_v29 }
 0x2b3   :  { %v843_v33 = vpack.c.bf16 %v1733_v31, %v1730_v28 }
 0x2b5   :  { %1860 = vmatprep.subr.bf16.mxu0 %v843_v33 }
 0x2b6   :  { %1861 = vmatpush3.bf16.msra.mxu0 %v843_v33 }
 0x2b7   :  { %1878 = vmatprep.subr.bf16.mxu0 %v2439_v23 }
 0x2b9   :  { %1863 = vmatmul.mubr.bf16.vlgmr.msra.gmra.mrb[32].mxu0 %v2381_v42 }
 0x2ba   :  { %1879 = vmatpush3.bf16.msra.mxu0 %v2439_v23  ;;  %1866 = vmatprep.mubr.bf16.mxu0 %v2383_v43  ;;  %v2510_v23 = vld [vmem:[#allocation8 + $0x8] sm:$0xff]  }
 0x2bb   :  { %1880 = vmatprep.subr.bf16.mxu0 %v2436_v20 }
 0x2be   :  { %1881 = vmatpush3.bf16.msra.mxu0 %v2436_v20  ;;  %v2508_v20 = vld [vmem:[#allocation8] sm:$0xff]  }
 0x2bf   :  { %1882 = vmatprep.subr.bf16.mxu0 %v2451_v3  ;;  %1910 = vmatprep.subr.bf16.mxu1 %v2508_v20 }
 0x2c0   :  { %1911 = vmatpush3.bf16.msra.mxu1 %v2508_v20 }
 0x2c1   :  { %1867 = vmatmul.mubr.bf16.gmra.mrb[36].mxu0 %v2390_v44  ;;  %1912 = vmatprep.subr.bf16.mxu1 %v2510_v23 }
 0x2c2   :  { %1883 = vmatpush3.bf16.msra.mxu0 %v2451_v3  ;;  %1870 = vmatprep.mubr.bf16.mxu0 %v2393_v45  ;;  %v2519_v3 = vld [vmem:[#allocation8 + $0x18] sm:$0xff]  }
 0x2c3   :  { %1884 = vmatprep.subr.bf16.mxu0 %v2448_v39 }
 0x2c4   :  { %1913 = vmatpush3.bf16.msra.mxu1 %v2510_v23 }
 0x2c6   :  { %1885 = vmatpush3.bf16.msra.mxu0 %v2448_v39  ;;  %v2515_v39 = vld [vmem:[#allocation8 + $0x10] sm:$0xff]  }
 0x2c7   :  { %1886 = vmatprep.subr.bf16.mxu0 %v2463_v53  ;;  %1914 = vmatprep.subr.bf16.mxu1 %v2515_v39 }
 0x2c8   :  { %1915 = vmatpush3.bf16.msra.mxu1 %v2515_v39 }
 0x2c9   :  { %1871 = vmatmul.mubr.bf16.gmra.mrb[40].mxu0 %v2400_v0  ;;  %1916 = vmatprep.subr.bf16.mxu1 %v2519_v3 }
 0x2ca   :  { %1887 = vmatpush3.bf16.msra.mxu0 %v2463_v53  ;;  %1874 = vmatprep.mubr.bf16.mxu0 %v2403_v1  ;;  %v2531_v53 = vld [vmem:[#allocation8 + $0x30] sm:$0xff]  }
 0x2cb   :  { %1888 = vmatprep.subr.bf16.mxu0 %v2460_v48 }
 0x2cc   :  { %1917 = vmatpush3.bf16.msra.mxu1 %v2519_v3 }
 0x2ce   :  { %1889 = vmatpush3.bf16.msra.mxu0 %v2460_v48  ;;  %v2527_v48 = vld [vmem:[#allocation8 + $0x28] sm:$0xff]  }
 0x2cf   :  { %1890 = vmatprep.subr.bf16.mxu0 %v2474_v24 }
 0x2d1   :  { %1875 = vmatmul.mubr.bf16.gmra.mrb[44].mxu0 %v2410_v2 }
 0x2d2   :  { %1891 = vmatpush3.bf16.msra.mxu0 %v2474_v24  ;;  %1894 = vmatprep.mubr.bf16.mxu0 %v2377_v32 }
 0x2d3   :  { %1892 = vmatprep.subr.bf16.mxu0 %v2472_v21 }
 0x2d6   :  { %1893 = vmatpush3.bf16.msra.mxu0 %v2472_v21  ;;  %v2535_v21 = vld [vmem:[#allocation8 + $0x38] sm:$0xff]  }
 0x2d9   :  { %1895 = vmatmul.mubr.bf16.vlgmr.msra.gmra.mrb[48].mxu0 %v2381_v42 }
 0x2da   :  { %1898 = vmatprep.mubr.bf16.mxu0 %v2383_v43 }
 0x2e1   :  { %1899 = vmatmul.mubr.bf16.gmra.mrb[52].mxu0 %v2390_v44 }
 0x2e2   :  { %1902 = vmatprep.mubr.bf16.mxu0 %v2393_v45 }
 0x2e9   :  { %1903 = vmatmul.mubr.bf16.gmra.mrb[56].mxu0 %v2400_v0 }
 0x2ea   :  { %1906 = vmatprep.mubr.bf16.mxu0 %v2403_v1 }
 0x2f1   :  { %1907 = vmatmul.mubr.bf16.gmra.mrb[60].mxu0 %v2410_v2 }
 0x2f2   :  { %1958 = vmatprep.mubr.bf16.mxu0 %v2377_v32  ;;  %v2523_v32 = vld [vmem:[#allocation8 + $0x20] sm:$0xff]  }
 0x2f3   :  { %1918 = vmatprep.subr.bf16.mxu1 %v2523_v32 }
 0x2f4   :  { %1919 = vmatpush3.bf16.msra.mxu1 %v2523_v32 }
 0x2f5   :  { %1920 = vmatprep.subr.bf16.mxu1 %v2527_v48 }
 0x2f8   :  { %1921 = vmatpush3.bf16.msra.mxu1 %v2527_v48 }
 0x2f9   :  { %1922 = vmatprep.subr.bf16.mxu1 %v2531_v53 }
 0x2fc   :  { %1923 = vmatpush3.bf16.msra.mxu1 %v2531_v53 }
 0x2fd   :  { %1924 = vmatprep.subr.bf16.mxu1 %v2535_v21 }
 0x300   :  { %1925 = vmatpush3.bf16.msra.mxu1 %v2535_v21 }
 0x301   :  { %1974 = vmatprep.subr.bf16.mxu1 %v2508_v20 }
 0x38c   :  { %v1864_v24 = vpop.f32.mrb[32].mxu0 }
 0x38d   :  { %v887_v34 = vadd.f32 %v1864_v24, %v2421_v49  ;;  %v878_v35 = vpop.f32.mrb[33].mxu0 }
 0x38e   :  { %v879_v36 = vadd.f32 %v2421_v49, %v878_v35  ;;  %v1865_v37 = vpop.f32.mrb[34].mxu0 }
 0x38f   :  { %v959_v38 = vmul.f32 %v2426_v50, %v887_v34  ;;  %v890_v40 = vadd.f32 %v1865_v37, %v2421_v49  ;;  %v881_v41 = vpop.f32.mrb[35].mxu0  ;;  %vm943_vm0 = vcmp.ge.f32.partialorder %v887_v34, 0.0 }
 0x390   :  { %v957_v4 = vmul.f32 %v2426_v50, %v879_v36  ;;  %v882_v5 = vadd.f32 %v2421_v49, %v881_v41  ;;  %vm941_vm1 = vcmp.ge.f32.partialorder %v879_v36, 0.0 }
 0x391   :  { %vm944_vm2 = vcmp.ge.f32.partialorder %v890_v40, 0.0  ;;  %v960_v6 = vmul.f32 %v2426_v50, %v890_v40  ;;  %v975_v8 = vsel %vm943_vm0, %v887_v34, %v959_v38 }
 0x392   :  { %vm942_vm3 = vcmp.ge.f32.partialorder %v882_v5, 0.0  ;;  %v958_v7 = vmul.f32 %v2426_v50, %v882_v5  ;;  %v973_v12 = vsel %vm941_vm1, %v879_v36, %v957_v4 }
 0x393   :  { %v976_v9 = vsel %vm944_vm2, %v890_v40, %v960_v6 }
 0x394   :  { %v1868_v10 = vpop.f32.mrb[36].mxu0  ;;  %v974_v13 = vsel %vm942_vm3, %v882_v5, %v958_v7  ;;  %v990_v14 = vpack.c.bf16 %v976_v9, %v975_v8 }
 0x395   :  { %v903_v15 = vadd.f32 %v1868_v10, %v2421_v49  ;;  %v894_v16 = vpop.f32.mrb[37].mxu0  ;;  %v989_v46 = vpack.c.bf16 %v974_v13, %v973_v12 }
 0x396   :  { %v895_v47 = vadd.f32 %v2421_v49, %v894_v16  ;;  %v1869_v51 = vpop.f32.mrb[38].mxu0 }
 0x397   :  { %v963_v52 = vmul.f32 %v2426_v50, %v903_v15  ;;  %v906_v54 = vadd.f32 %v1869_v51, %v2421_v49  ;;  %v897_v55 = vpop.f32.mrb[39].mxu0  ;;  %1942 = vmatprep.subr.bf16.mxu0 %v989_v46  ;;  %vm947_vm4 = vcmp.ge.f32.partialorder %v903_v15, 0.0 }
 0x398   :  { %v961_v56 = vmul.f32 %v2426_v50, %v895_v47  ;;  %v898_v57 = vadd.f32 %v2421_v49, %v897_v55  ;;  %1943 = vmatpush3.bf16.msra.mxu0 %v989_v46  ;;  %vm945_vm5 = vcmp.ge.f32.partialorder %v895_v47, 0.0 }
 0x399   :  { %vm948_vm6 = vcmp.ge.f32.partialorder %v906_v54, 0.0  ;;  %v964_v58 = vmul.f32 %v2426_v50, %v906_v54  ;;  %1944 = vmatprep.subr.bf16.mxu0 %v990_v14  ;;  %v979_v60 = vsel %vm947_vm4, %v903_v15, %v963_v52 }
 0x39a   :  { %vm946_vm7 = vcmp.ge.f32.partialorder %v898_v57, 0.0  ;;  %v962_v59 = vmul.f32 %v2426_v50, %v898_v57  ;;  %v977_v63 = vsel %vm945_vm5, %v895_v47, %v961_v56 }
 0x39b   :  { %v980_v61 = vsel %vm948_vm6, %v906_v54, %v964_v58 }
 0x39c   :  { %v1872_v62 = vpop.f32.mrb[40].mxu0  ;;  %1945 = vmatpush3.bf16.msra.mxu0 %v990_v14  ;;  %v978_v11 = vsel %vm946_vm7, %v898_v57, %v962_v59  ;;  %v992_v17 = vpack.c.bf16 %v980_v61, %v979_v60 }
 0x39d   :  { %v919_v18 = vadd.f32 %v1872_v62, %v2421_v49  ;;  %v910_v19 = vpop.f32.mrb[41].mxu0  ;;  %v991_v22 = vpack.c.bf16 %v978_v11, %v977_v63 }
 0x39e   :  { %v911_v25 = vadd.f32 %v2421_v49, %v910_v19  ;;  %v1873_v26 = vpop.f32.mrb[42].mxu0 }
 0x39f   :  { %v967_v27 = vmul.f32 %v2426_v50, %v919_v18  ;;  %v922_v28 = vadd.f32 %v1873_v26, %v2421_v49  ;;  %v913_v29 = vpop.f32.mrb[43].mxu0  ;;  %1946 = vmatprep.subr.bf16.mxu0 %v991_v22  ;;  %vm951_vm8 = vcmp.ge.f32.partialorder %v919_v18, 0.0 }
 0x3a0   :  { %v965_v30 = vmul.f32 %v2426_v50, %v911_v25  ;;  %v914_v31 = vadd.f32 %v2421_v49, %v913_v29  ;;  %1947 = vmatpush3.bf16.msra.mxu0 %v991_v22  ;;  %vm949_vm9 = vcmp.ge.f32.partialorder %v911_v25, 0.0 }
 0x3a1   :  { %vm952_vm10 = vcmp.ge.f32.partialorder %v922_v28, 0.0  ;;  %v968_v33 = vmul.f32 %v2426_v50, %v922_v28  ;;  %1948 = vmatprep.subr.bf16.mxu0 %v992_v17  ;;  %v983_v34 = vsel %vm951_vm8, %v919_v18, %v967_v27 }
 0x3a2   :  { %vm950_vm11 = vcmp.ge.f32.partialorder %v914_v31, 0.0  ;;  %v966_v24 = vmul.f32 %v2426_v50, %v914_v31  ;;  %v981_v37 = vsel %vm949_vm9, %v911_v25, %v965_v30 }
 0x3a3   :  { %v984_v35 = vsel %vm952_vm10, %v922_v28, %v968_v33 }
 0x3a4   :  { %v1876_v36 = vpop.f32.mrb[44].mxu0  ;;  %1949 = vmatpush3.bf16.msra.mxu0 %v992_v17  ;;  %v982_v38 = vsel %vm950_vm11, %v914_v31, %v966_v24  ;;  %v994_v40 = vpack.c.bf16 %v984_v35, %v983_v34 }
 0x3a5   :  { %v935_v41 = vadd.f32 %v1876_v36, %v2421_v49  ;;  %v926_v4 = vpop.f32.mrb[45].mxu0  ;;  %v993_v5 = vpack.c.bf16 %v982_v38, %v981_v37 }
 0x3a6   :  { %v927_v6 = vadd.f32 %v2421_v49, %v926_v4  ;;  %v1877_v7 = vpop.f32.mrb[46].mxu0 }
 0x3a7   :  { %v971_v8 = vmul.f32 %v2426_v50, %v935_v41  ;;  %v938_v9 = vadd.f32 %v1877_v7, %v2421_v49  ;;  %v929_v10 = vpop.f32.mrb[47].mxu0  ;;  %1950 = vmatprep.subr.bf16.mxu0 %v993_v5  ;;  %vm955_vm12 = vcmp.ge.f32.partialorder %v935_v41, 0.0 }
 0x3a8   :  { %v969_v12 = vmul.f32 %v2426_v50, %v927_v6  ;;  %v930_v13 = vadd.f32 %v2421_v49, %v929_v10  ;;  %1951 = vmatpush3.bf16.msra.mxu0 %v993_v5  ;;  %vm953_vm13 = vcmp.ge.f32.partialorder %v927_v6, 0.0 }
 0x3a9   :  { %vm956_vm14 = vcmp.ge.f32.partialorder %v938_v9, 0.0  ;;  %v972_v14 = vmul.f32 %v2426_v50, %v938_v9  ;;  %1952 = vmatprep.subr.bf16.mxu0 %v994_v40  ;;  %v987_v16 = vsel %vm955_vm12, %v935_v41, %v971_v8 }
 0x3aa   :  { %vm954_vm15 = vcmp.ge.f32.partialorder %v930_v13, 0.0  ;;  %v970_v15 = vmul.f32 %v2426_v50, %v930_v13  ;;  %v985_v47 = vsel %vm953_vm13, %v927_v6, %v969_v12 }
 0x3ab   :  { %v988_v46 = vsel %vm956_vm14, %v938_v9, %v972_v14 }
 0x3ac   :  { %1953 = vmatpush3.bf16.msra.mxu0 %v994_v40  ;;  %v986_v51 = vsel %vm954_vm15, %v930_v13, %v970_v15  ;;  %v996_v52 = vpack.c.bf16 %v988_v46, %v987_v16  ;;  %v1896_v54 = vpop.f32.mrb[48].mxu0 }
 0x3ad   :  { %v995_v55 = vpack.c.bf16 %v986_v51, %v985_v47  ;;  %v1048_v56 = vpop.f32.mrb[49].mxu0 }
 0x3ae   :  { %v1897_v57 = vpop.f32.mrb[50].mxu0 }
 0x3af   :  { %1954 = vmatprep.subr.bf16.mxu0 %v995_v55  ;;  %v1112_v49 = vpack.c.bf16 %v1897_v57, %v1896_v54  ;;  %v1051_v58 = vpop.f32.mrb[51].mxu0 }
 0x3b0   :  { %1955 = vmatpush3.bf16.msra.mxu0 %v995_v55  ;;  %v1111_v59 = vpack.c.bf16 %v1051_v58, %v1048_v56 }
 0x3b1   :  { %1956 = vmatprep.subr.bf16.mxu0 %v996_v52 }
 0x3b2   :  { %1926 = vmatprep.mubr.bf16.mxu1 %v1111_v59 }
 0x3b3   :  { %1927 = vmatmul.mubr.bf16.vlgmr.msra.gmra.mrb[48].mxu1 %v1112_v49 }
 0x3b4   :  { %1957 = vmatpush3.bf16.msra.mxu0 %v996_v52  ;;  %v1900_v50 = vpop.f32.mrb[52].mxu0  ;;  %1975 = vmatpush3.bf16.msra.mxu1 %v2508_v20 }
 0x3b5   :  { %v1064_v60 = vpop.f32.mrb[53].mxu0  ;;  %1976 = vmatprep.subr.bf16.mxu1 %v2510_v23 }
 0x3b6   :  { %v1901_v61 = vpop.f32.mrb[54].mxu0 }
 0x3b7   :  { %1959 = vmatmul.mubr.bf16.vlgmr.msra.gmra.mrb[64].mxu0 %v2381_v42  ;;  %v1114_v62 = vpack.c.bf16 %v1901_v61, %v1900_v50  ;;  %v1067_v63 = vpop.f32.mrb[55].mxu0 }
 0x3b8   :  { %1962 = vmatprep.mubr.bf16.mxu0 %v2383_v43  ;;  %v1113_v11 = vpack.c.bf16 %v1067_v63, %v1064_v60  ;;  %1977 = vmatpush3.bf16.msra.mxu1 %v2510_v23 }
 0x3b9   :  { %1978 = vmatprep.subr.bf16.mxu1 %v2515_v39 }
 0x3ba   :  { %1930 = vmatprep.mubr.bf16.mxu1 %v1113_v11 }
 0x3bb   :  { %1931 = vmatmul.mubr.bf16.gmra.mrb[52].mxu1 %v1114_v62 }
 0x3bc   :  { %v1904_v17 = vpop.f32.mrb[56].mxu0  ;;  %1979 = vmatpush3.bf16.msra.mxu1 %v2515_v39 }
 0x3bd   :  { %v1080_v20 = vpop.f32.mrb[57].mxu0  ;;  %1980 = vmatprep.subr.bf16.mxu1 %v2519_v3 }
 0x3be   :  { %v1905_v18 = vpop.f32.mrb[58].mxu0 }
 0x3bf   :  { %1963 = vmatmul.mubr.bf16.gmra.mrb[68].mxu0 %v2390_v44  ;;  %v1116_v42 = vpack.c.bf16 %v1905_v18, %v1904_v17  ;;  %v1083_v19 = vpop.f32.mrb[59].mxu0 }
 0x3c0   :  { %1966 = vmatprep.mubr.bf16.mxu0 %v2393_v45  ;;  %v1115_v43 = vpack.c.bf16 %v1083_v19, %v1080_v20  ;;  %1981 = vmatpush3.bf16.msra.mxu1 %v2519_v3 }
 0x3c1   :  { %1982 = vmatprep.subr.bf16.mxu1 %v2523_v32 }
 0x3c2   :  { %1934 = vmatprep.mubr.bf16.mxu1 %v1115_v43 }
 0x3c3   :  { %1935 = vmatmul.mubr.bf16.gmra.mrb[56].mxu1 %v1116_v42 }
 0x3c4   :  { %v1908_v23 = vpop.f32.mrb[60].mxu0  ;;  %1983 = vmatpush3.bf16.msra.mxu1 %v2523_v32 }
 0x3c5   :  { %v1096_v39 = vpop.f32.mrb[61].mxu0  ;;  %1984 = vmatprep.subr.bf16.mxu1 %v2527_v48 }
 0x3c6   :  { %v1909_v22 = vpop.f32.mrb[62].mxu0 }
 0x3c7   :  { %1967 = vmatmul.mubr.bf16.gmra.mrb[72].mxu0 %v2400_v0  ;;  %v1118_v44 = vpack.c.bf16 %v1909_v22, %v1908_v23  ;;  %v1099_v25 = vpop.f32.mrb[63].mxu0  ;;  %v2598_v0 = vld [vmem:[%s2653_s6] ss:$0 sm:$0xff]  ;;  %s2221_s6 = smov [#allocation10]  }
 0x3c8   :  { %1970 = vmatprep.mubr.bf16.mxu0 %v2403_v1  ;;  %v1117_v45 = vpack.c.bf16 %v1099_v25, %v1096_v39  ;;  %1985 = vmatpush3.bf16.msra.mxu1 %v2527_v48  ;;  %s1509_s8 = sshll.u32 %s2221_s6, 4  ;;  %s1510_s8 = int_to_ptr.vmem [resolvable:$true] %s1509_s8 }
 0x3c9   :  { %1986 = vmatprep.subr.bf16.mxu1 %v2531_v53  ;;  %s2183_s9 = scalar_lea.vmem %s1510_s8, 4096  ;;  %p2188_p5 = scmp.lt.s32.totalorder %s1510_s8, %s1510_s8 }
 0x3ca   :  { %1938 = vmatprep.mubr.bf16.mxu1 %v1117_v45  ;;  %p2184_p4 = scmp.ne.s32.totalorder %s1510_s8, %s2183_s9  ;;  %p2189_p6 = scmp.lt.s32.totalorder %s2183_s9, %s2183_s9 }
 0x3cb   :  { %1939 = vmatmul.mubr.bf16.gmra.mrb[60].mxu1 %v1118_v44 }
 0x3cc   :  { %1987 = vmatpush3.bf16.msra.mxu1 %v2531_v53  ;;  %p2190_p7 = por %p2189_p6, %p2188_p5 }
 0x3cd   :  { %1988 = vmatprep.subr.bf16.mxu1 %v2535_v21 }
 0x3ce   :  { %p2191_p8 = pnand %p2190_p7, %p2184_p4 }
 0x3cf   :  { %1971 = vmatmul.mubr.bf16.gmra.mrb[76].mxu0 %v2410_v2 }
 0x3d0   :  { %1989 = vmatpush3.bf16.msra.mxu1 %v2535_v21 }
 0x486   :  { %v1928_v1 = vpop.f32.mrb[48].mxu1 }
 0x487   :  { %v1216_v3 = vadd.f32 %v1928_v1, %v2598_v0  ;;  %v1207_v32 = vpop.f32.mrb[49].mxu1 }
 0x488   :  { %v1208_v48 = vadd.f32 %v2598_v0, %v1207_v32  ;;  %v1929_v26 = vpop.f32.mrb[50].mxu1 }
 0x489   :  { %1474 = vst [vmem:[#allocation10 + $0x20] sm:$0xff] %v1216_v3  ;;  %v1219_v53 = vadd.f32 %v1929_v26, %v2598_v0  ;;  %v1210_v27 = vpop.f32.mrb[51].mxu1 }
 0x48a   :  { %v1960_v28 = vpop.f32.mrb[64].mxu0  ;;  %1472 = vst [vmem:[#allocation10] sm:$0xff] %v1208_v48  ;;  %v1211_v2 = vadd.f32 %v2598_v0, %v1210_v27 }
 0x48b   :  { %v1304_v21 = vpop.f32.mrb[65].mxu0  ;;  %1475 = vst [vmem:[#allocation10 + $0x30] sm:$0xff] %v1219_v53 }
 0x48c   :  { %v1961_v29 = vpop.f32.mrb[66].mxu0  ;;  %1473 = vst [vmem:[#allocation10 + $0x10] sm:$0xff] %v1211_v2 }
 0x48d   :  { %v1368_v30 = vpack.c.bf16 %v1961_v29, %v1960_v28  ;;  %v1307_v31 = vpop.f32.mrb[67].mxu0 }
 0x48e   :  { %v1367_v33 = vpack.c.bf16 %v1307_v31, %v1304_v21  ;;  %v1932_v24 = vpop.f32.mrb[52].mxu1 }
 0x48f   :  { %v1232_v34 = vadd.f32 %v1932_v24, %v2598_v0  ;;  %v1223_v35 = vpop.f32.mrb[53].mxu1 }
 0x490   :  { %1990 = vmatprep.mubr.bf16.mxu1 %v1367_v33  ;;  %v1224_v36 = vadd.f32 %v2598_v0, %v1223_v35  ;;  %v1933_v37 = vpop.f32.mrb[54].mxu1 }
 0x491   :  { %1991 = vmatmul.mubr.bf16.vlgmr.msra.gmra.mrb[64].mxu1 %v1368_v30  ;;  %1478 = vst [vmem:[#allocation10 + $0x60] sm:$0xff] %v1232_v34  ;;  %v1235_v38 = vadd.f32 %v1933_v37, %v2598_v0  ;;  %v1226_v40 = vpop.f32.mrb[55].mxu1 }
 0x492   :  { %v1964_v41 = vpop.f32.mrb[68].mxu0  ;;  %1476 = vst [vmem:[#allocation10 + $0x40] sm:$0xff] %v1224_v36  ;;  %v1227_v4 = vadd.f32 %v2598_v0, %v1226_v40 }
 0x493   :  { %v1320_v5 = vpop.f32.mrb[69].mxu0  ;;  %1479 = vst [vmem:[#allocation10 + $0x70] sm:$0xff] %v1235_v38 }
 0x494   :  { %v1965_v6 = vpop.f32.mrb[70].mxu0  ;;  %1477 = vst [vmem:[#allocation10 + $0x50] sm:$0xff] %v1227_v4 }
 0x495   :  { %v1370_v7 = vpack.c.bf16 %v1965_v6, %v1964_v41  ;;  %v1323_v8 = vpop.f32.mrb[71].mxu0 }
 0x496   :  { %v1369_v9 = vpack.c.bf16 %v1323_v8, %v1320_v5  ;;  %v1936_v10 = vpop.f32.mrb[56].mxu1 }
 0x497   :  { %v1248_v12 = vadd.f32 %v1936_v10, %v2598_v0  ;;  %v1239_v13 = vpop.f32.mrb[57].mxu1 }
 0x498   :  { %1994 = vmatprep.mubr.bf16.mxu1 %v1369_v9  ;;  %v1240_v14 = vadd.f32 %v2598_v0, %v1239_v13  ;;  %v1937_v15 = vpop.f32.mrb[58].mxu1 }
 0x499   :  { %1995 = vmatmul.mubr.bf16.gmra.mrb[68].mxu1 %v1370_v7  ;;  %1482 = vst [vmem:[#allocation10 + $0xa0] sm:$0xff] %v1248_v12  ;;  %v1251_v16 = vadd.f32 %v1937_v15, %v2598_v0  ;;  %v1242_v46 = vpop.f32.mrb[59].mxu1 }
 0x49a   :  { %v1968_v47 = vpop.f32.mrb[72].mxu0  ;;  %1480 = vst [vmem:[#allocation10 + $0x80] sm:$0xff] %v1240_v14  ;;  %v1243_v51 = vadd.f32 %v2598_v0, %v1242_v46 }
 0x49b   :  { %v1336_v52 = vpop.f32.mrb[73].mxu0  ;;  %1483 = vst [vmem:[#allocation10 + $0xb0] sm:$0xff] %v1251_v16 }
 0x49c   :  { %v1969_v54 = vpop.f32.mrb[74].mxu0  ;;  %1481 = vst [vmem:[#allocation10 + $0x90] sm:$0xff] %v1243_v51 }
 0x49d   :  { %v1372_v55 = vpack.c.bf16 %v1969_v54, %v1968_v47  ;;  %v1339_v56 = vpop.f32.mrb[75].mxu0 }
 0x49e   :  { %v1371_v57 = vpack.c.bf16 %v1339_v56, %v1336_v52  ;;  %v1940_v49 = vpop.f32.mrb[60].mxu1 }
 0x49f   :  { %v1264_v58 = vadd.f32 %v1940_v49, %v2598_v0  ;;  %v1255_v59 = vpop.f32.mrb[61].mxu1 }
 0x4a0   :  { %1998 = vmatprep.mubr.bf16.mxu1 %v1371_v57  ;;  %v1256_v50 = vadd.f32 %v2598_v0, %v1255_v59  ;;  %v1941_v60 = vpop.f32.mrb[62].mxu1 }
 0x4a1   :  { %1999 = vmatmul.mubr.bf16.gmra.mrb[72].mxu1 %v1372_v55  ;;  %1486 = vst [vmem:[#allocation10 + $0xe0] sm:$0xff] %v1264_v58  ;;  %v1267_v61 = vadd.f32 %v1941_v60, %v2598_v0  ;;  %v1258_v62 = vpop.f32.mrb[63].mxu1 }
 0x4a2   :  { %v1972_v63 = vpop.f32.mrb[76].mxu0  ;;  %1484 = vst [vmem:[#allocation10 + $0xc0] sm:$0xff] %v1256_v50  ;;  %v1259_v11 = vadd.f32 %v2598_v0, %v1258_v62 }
 0x4a3   :  { %v1352_v17 = vpop.f32.mrb[77].mxu0  ;;  %1487 = vst [vmem:[#allocation10 + $0xf0] sm:$0xff] %v1267_v61 }
 0x4a4   :  { %v1973_v20 = vpop.f32.mrb[78].mxu0  ;;  %1485 = vst [vmem:[#allocation10 + $0xd0] sm:$0xff] %v1259_v11 }
 0x4a5   :  { %v1374_v18 = vpack.c.bf16 %v1973_v20, %v1972_v63  ;;  %v1355_v42 = vpop.f32.mrb[79].mxu0 }
 0x4a6   :  { %v1373_v19 = vpack.c.bf16 %v1355_v42, %v1352_v17 }
 0x4a8   :  { %2002 = vmatprep.mubr.bf16.mxu1 %v1373_v19 }
 0x4a9   :  { %2003 = vmatmul.mubr.bf16.gmra.mrb[76].mxu1 %v1374_v18 }
 0x564   :  { %v1992_v43 = vpop.f32.mrb[64].mxu1 }
 0x565   :  { %v1418_v23 = vadd.f32 %v1992_v43, %v2598_v0  ;;  %v1409_v39 = vpop.f32.mrb[65].mxu1 }
 0x566   :  { %v1410_v22 = vadd.f32 %v2598_v0, %v1409_v39  ;;  %v1993_v44 = vpop.f32.mrb[66].mxu1 }
 0x567   :  { %1490 = vst [vmem:[#allocation10 + $0x28] sm:$0xff] %v1418_v23  ;;  %v1421_v25 = vadd.f32 %v1993_v44, %v2598_v0  ;;  %v1412_v45 = vpop.f32.mrb[67].mxu1 }
 0x568   :  { %1488 = vst [vmem:[#allocation10 + $0x8] sm:$0xff] %v1410_v22  ;;  %v1413_v1 = vadd.f32 %v2598_v0, %v1412_v45 }
 0x569   :  { %1491 = vst [vmem:[#allocation10 + $0x38] sm:$0xff] %v1421_v25 }
 0x56a   :  { %1489 = vst [vmem:[#allocation10 + $0x18] sm:$0xff] %v1413_v1 }
 0x56c   :  { %v1996_v3 = vpop.f32.mrb[68].mxu1 }
 0x56d   :  { %v1434_v32 = vadd.f32 %v1996_v3, %v2598_v0  ;;  %v1425_v48 = vpop.f32.mrb[69].mxu1 }
 0x56e   :  { %v1426_v26 = vadd.f32 %v2598_v0, %v1425_v48  ;;  %v1997_v53 = vpop.f32.mrb[70].mxu1 }
 0x56f   :  { %1494 = vst [vmem:[#allocation10 + $0x68] sm:$0xff] %v1434_v32  ;;  %v1437_v27 = vadd.f32 %v1997_v53, %v2598_v0  ;;  %v1428_v28 = vpop.f32.mrb[71].mxu1 }
 0x570   :  { %1492 = vst [vmem:[#allocation10 + $0x48] sm:$0xff] %v1426_v26  ;;  %v1429_v2 = vadd.f32 %v2598_v0, %v1428_v28 }
 0x571   :  { %1495 = vst [vmem:[#allocation10 + $0x78] sm:$0xff] %v1437_v27 }
 0x572   :  { %1493 = vst [vmem:[#allocation10 + $0x58] sm:$0xff] %v1429_v2 }
 0x574   :  { %v2000_v21 = vpop.f32.mrb[72].mxu1 }
 0x575   :  { %v1450_v29 = vadd.f32 %v2000_v21, %v2598_v0  ;;  %v1441_v30 = vpop.f32.mrb[73].mxu1 }
 0x576   :  { %v1442_v31 = vadd.f32 %v2598_v0, %v1441_v30  ;;  %v2001_v33 = vpop.f32.mrb[74].mxu1 }
 0x577   :  { %1498 = vst [vmem:[#allocation10 + $0xa8] sm:$0xff] %v1450_v29  ;;  %v1453_v24 = vadd.f32 %v2001_v33, %v2598_v0  ;;  %v1444_v34 = vpop.f32.mrb[75].mxu1 }
 0x578   :  { %1496 = vst [vmem:[#allocation10 + $0x88] sm:$0xff] %v1442_v31  ;;  %v1445_v35 = vadd.f32 %v2598_v0, %v1444_v34 }
 0x579   :  { %1499 = vst [vmem:[#allocation10 + $0xb8] sm:$0xff] %v1453_v24 }
 0x57a   :  { %1497 = vst [vmem:[#allocation10 + $0x98] sm:$0xff] %v1445_v35 }
 0x57c   :  { %v2004_v36 = vpop.f32.mrb[76].mxu1 }
 0x57d   :  { %v1466_v37 = vadd.f32 %v2004_v36, %v2598_v0  ;;  %v1457_v38 = vpop.f32.mrb[77].mxu1 }
 0x57e   :  { %v1458_v40 = vadd.f32 %v2598_v0, %v1457_v38  ;;  %v2005_v41 = vpop.f32.mrb[78].mxu1 }
 0x57f   :  { %1502 = vst [vmem:[#allocation10 + $0xe8] sm:$0xff] %v1466_v37  ;;  %v1469_v4 = vadd.f32 %v2005_v41, %v2598_v0  ;;  %v1460_v5 = vpop.f32.mrb[79].mxu1 }
 0x580   :  { %1500 = vst [vmem:[#allocation10 + $0xc8] sm:$0xff] %v1458_v40  ;;  %v1461_v6 = vadd.f32 %v2598_v0, %v1460_v5 }
 0x581   :  { %1503 = vst [vmem:[#allocation10 + $0xf8] sm:$0xff] %v1469_v4 }
 0x582   :  { %1501 = vst [vmem:[#allocation10 + $0xd8] sm:$0xff] %v1461_v6 }
 0x583   :  { %2194 = shalt.err (!%p2191_p8)
}
 0x584   :  { %s2195_s14 = scalar_lea.hbm %s2654_s7, 4096 }
 0x585   :  { %p2196_p9 = scmp.ne.s32.totalorder %s2654_s7, %s2195_s14  ;;  %p2199_p10 = scmp.lt.u32.totalorder %s2195_s14, %s2654_s7 }
 0x587   :  { %p2201_p11 = pnand %p2199_p10, %p2196_p9 }
 0x589   :  { %2204 = shalt.err (!%p2201_p11)
}
 0x58a   :  { %1515 = dma.vmem_to_hbm [thread:$0]  %s1510_s8, 4096, %s2654_s7, [#allocation4], %s2214_s11, %s2214_s11, %s2215_s12  }
 0x58b   :  { %2211 = dma.done.wait [#allocation4], 4096  }
 0x58c   :  { %2212 = vsyncadd [#allocation4], 4294963200 }
 0x58d   :  { %1519 = vsyncpa [#allocation3], 1 }
 0x58e   :  { %1520 = vsyncpa [#allocation6], 1 }
 0x58f   :  { %1521 = vsyncpa [#allocation9], 1 }
 0x590   :  { %1522 = vsyncpa [#allocation4], 1 }

</bundles_post_ra>
